<compile_context>
chip_gen: v5e
topology: v5e:2x2
jax: 0.10.0
libtpu: 0.0.40
codegen_flags: <defaults>
</compile_context>

<pallas_src>
import functools

import numpy as np
import jax
import jax.numpy as jnp
from jax.experimental import pallas as pl
from jax.experimental.pallas import tpu as pltpu


def _interp_matrix(n: int) -> np.ndarray:
    """(2n, n) matrix implementing bilinear scale-2 upsampling, align_corners=False."""
    out = 2 * n
    coords = (np.arange(out, dtype=np.float64) + 0.5) / 2.0 - 0.5
    lo = np.floor(coords)
    frac = (coords - lo).astype(np.float32)
    i0 = np.clip(lo.astype(np.int64), 0, n - 1)
    i1 = np.clip(lo.astype(np.int64) + 1, 0, n - 1)
    A = np.zeros((out, n), np.float32)
    rows = np.arange(out)
    np.add.at(A, (rows, i0), 1.0 - frac)   # clamped edge taps collapse onto same index,
    np.add.at(A, (rows, i1), frac)         # weights sum to 1 -> matches torch behaviour
    return A


def _round_up(x: int, m: int) -> int:
    return (x + m - 1) // m * m


def _pick_pack(H: int, W: int) -> int:
    """Output rows packed per lane-row so the stored last dim is >=128 when possible."""
    if 2 * W >= 128:
        return 1
    k = min(2 * H, max(1, 128 // (2 * W)))
    while k > 1 and (2 * H) % k != 0:
        k -= 1
    return max(k, 1)


def _vmem_budget_bytes() -> int:
    """Conservative, generation-aware per-step VMEM budget (v7x has 64 MiB/TC)."""
    try:
        cap = int(pltpu.get_tpu_info().vmem_capacity_bytes)
        return min(cap // 8, 12 * 1024 * 1024)
    except Exception:
        return 8 * 1024 * 1024


def _pick_bn(N: int, Cin: int, Cout: int, H: int, W: int, k: int) -> int:
    """Images per grid step, sized from PADDED (8,128)-tiled, double-buffered footprints."""
    in_bytes = Cin * _round_up(H, 8) * _round_up(W, 128) * 4
    out_bytes = _round_up(Cout * 2 * H // k, 8) * _round_up(k * 2 * W, 128) * 4
    per_image = 2 * (in_bytes + out_bytes)                  # x2: double-buffered DMA
    cap_vmem = max(1, _vmem_budget_bytes() // max(per_image, 1))
    cap_rows = max(1, 4096 // max(Cout * 2 * H, 1))         # bound in-kernel slab rows (vregs)
    cap = max(1, min(cap_vmem, cap_rows))
    best = 1                                                # no forced ">=2 steps": per-step
    for bn in range(1, N + 1):                              # work is tiny, fewer steps wins
        if N % bn == 0 and bn <= cap:
            best = bn
    return best


def _upsample_conv_kernel(w_sref, x_ref, ahp_ref, bdw_ref, o_ref, y_sc, s_sc,
                          *, bn, cin, cout, H, W, k):
    # w_sref : SMEM (cout, cin) f32           -- 1x1 conv weights (scalars)
    # x_ref  : VMEM (bn, cin, H, W)           -- NCHW input block
    # ahp_ref: VMEM (2H, H) f32               -- row-permuted H interpolation matrix
    # bdw_ref: VMEM (k*W, k*2W) f32           -- kron(I_k, A_w^T)
    # o_ref  : VMEM (bn, cout*2H//k, k*2W)    -- lane-packed NCHW output block
    # y_sc   : VMEM (H, bn*cout*W) f32        -- conv outputs, lane-stacked
    # s_sc   : VMEM (bn*cout*2H//k, k*W) f32  -- H-upsampled slabs, row-packed
    r = 2 * H // k

    # 1) 1x1 conv (channel mix) on the pre-upsample grid; each (b,o) slab goes side by
    #    side along the lane axis so the H-upsample below is ONE fat matmul.
    for b in range(bn):
        xs = [x_ref[b, c] for c in range(cin)]
        for o in range(cout):
            acc = w_sref[o, 0] * xs[0]
            for c in range(1, cin):
                acc = acc + w_sref[o, c] * xs[c]
            s = b * cout + o
            y_sc[:, s * W:(s + 1) * W] = acc

    # 2) H-upsample: one MXU call, M=2H, K=H, N=bn*cout*W lanes.
    #    ahp rows are ordered (j, rr); output H index i = rr*k + j.
    t = jnp.dot(ahp_ref[...], y_sc[...], preferred_element_type=jnp.float32)

    # 3) Re-pack so k consecutive output rows of one (b,o) image share a lane row.
    #    Every copy is a contiguous static sub-block (no reshape/transpose needed).
    for s in range(bn * cout):
        for j in range(k):
            s_sc[s * r:(s + 1) * r, j * W:(j + 1) * W] = \
                t[j * r:(j + 1) * r, s * W:(s + 1) * W]

    # 4) W-upsample via k-block-diagonal A_w^T: one MXU call, output already lane-dense
    #    (last dim k*2W), so the stores below are full-width vst.
    z = jnp.dot(s_sc[...], bdw_ref[...], preferred_element_type=jnp.float32)

    cr = cout * r
    for b in range(bn):
        o_ref[b] = z[b * cr:(b + 1) * cr, :].astype(o_ref.dtype)


@functools.lru_cache(maxsize=None)
def _build_upsample(N, Cin, H, W, Cout, dtype_name):
    k = _pick_pack(H, W)
    bn = _pick_bn(N, Cin, Cout, H, W, k)
    r = 2 * H // k

    A_h = _interp_matrix(H)                                  # (2H, H)
    perm = np.arange(2 * H).reshape(r, k).T.reshape(-1)      # row j*r+rr <- output row rr*k+j
    A_hp = np.ascontiguousarray(A_h[perm])
    A_wT = np.ascontiguousarray(_interp_matrix(W).T)         # (W, 2W)
    BD = np.kron(np.eye(k, dtype=np.float32), A_wT)          # (k*W, k*2W)

    out_rows = Cout * r
    out_lanes = k * 2 * W
    dtype = np.dtype(dtype_name)

    flops = (2 * N * Cout * Cin * H * W
             + 2 * (2 * H) * H * (N * Cout * W)
             + 2 * (N * Cout * r) * (k * W) * out_lanes)
    bytes_accessed = 4 * (N * Cin * H * W + N * Cout * 4 * H * W
                          + Cout * Cin + 2 * H * H + k * W * out_lanes)

    kernel = functools.partial(_upsample_conv_kernel,
                               bn=bn, cin=Cin, cout=Cout, H=H, W=W, k=k)

    call = pl.pallas_call(
        kernel,
        out_shape=jax.ShapeDtypeStruct((N, out_rows, out_lanes), dtype),
        grid_spec=pltpu.PrefetchScalarGridSpec(
            num_scalar_prefetch=0,
            grid=(N // bn,),
            in_specs=[
                pl.BlockSpec(memory_space=pltpu.MemorySpace.SMEM),          # conv weights
                pl.BlockSpec((bn, Cin, H, W), lambda i: (i, 0, 0, 0)),      # x, NCHW
                pl.BlockSpec((2 * H, H), lambda i: (0, 0)),                 # A_h (permuted)
                pl.BlockSpec((k * W, out_lanes), lambda i: (0, 0)),         # kron(I_k, A_w^T)
            ],
            out_specs=pl.BlockSpec((bn, out_rows, out_lanes), lambda i: (i, 0, 0)),
            scratch_shapes=[
                pltpu.VMEM((H, bn * Cout * W), jnp.float32),
                pltpu.VMEM((bn * Cout * r, k * W), jnp.float32),
            ],
        ),
        compiler_params=pltpu.CompilerParams(dimension_semantics=("parallel",)),
        cost_estimate=pl.CostEstimate(flops=flops, transcendentals=0,
                                      bytes_accessed=bytes_accessed),
    )

    ahp = jnp.asarray(A_hp)
    bd = jnp.asarray(BD)

    def run(x, w2):
        out = call(w2, x, ahp, bd)
        # Free row-major reshape back to NCHW -- no transpose, no extra HBM pass.
        return out.reshape(N, Cout, 2 * H, 2 * W)

    return jax.jit(run)


def upsample_forward(x_nchw, conv_w):
    """Equivalent of UpSample.forward: bilinear x2 (align_corners=False) + 1x1 conv (no bias)."""
    N, Cin, H, W = x_nchw.shape
    Cout = conv_w.shape[0]
    w2 = conv_w.reshape(Cout, Cin).astype(jnp.float32)
    fn = _build_upsample(int(N), int(Cin), int(H), int(W), int(Cout), str(x_nchw.dtype))
    return fn(x_nchw, w2)


def _reference(x_nchw, conv_w):
    """Pure-JAX reference: gather-based bilinear (half-pixel) upsample + 1x1 conv."""
    N, Cin, H, W = x_nchw.shape
    x = jnp.transpose(x_nchw, (0, 2, 3, 1))

    def up_axis(arr, axis):
        n = arr.shape[axis]
        coords = (jnp.arange(2 * n, dtype=jnp.float32) + 0.5) / 2.0 - 0.5
        lo = jnp.floor(coords)
        frac = coords - lo
        i0 = jnp.clip(lo.astype(jnp.int32), 0, n - 1)
        i1 = jnp.clip(lo.astype(jnp.int32) + 1, 0, n - 1)
        a0 = jnp.take(arr, i0, axis=axis)
        a1 = jnp.take(arr, i1, axis=axis)
        shape = [1] * arr.ndim
        shape[axis] = 2 * n
        f = frac.reshape(shape)
        return a0 * (1.0 - f) + a1 * f

    up = up_axis(up_axis(x, 1), 2)
    y = jnp.einsum("nhwc,oc->nohw", up, conv_w.reshape(conv_w.shape[0], Cin))
    return y


if __name__ == "__main__":
    in_channels = 4
    s_factor = 2
    cin = in_channels + s_factor
    N, H, W = 2, 16, 16

    key = jax.random.PRNGKey(0)
    kx, kw = jax.random.split(key)
    x = jax.random.normal(kx, (N, cin, H, W), jnp.float32)
    # nn.Conv2d(in_channels + s_factor, in_channels, 1, bias=False) -> (Cout, Cin, 1, 1)
    conv_w = 0.1 * jax.random.normal(kw, (in_channels, cin, 1, 1), jnp.float32)

    y = upsample_forward(x, conv_w)
    y = jax.block_until_ready(y)

    y_ref = _reference(x, conv_w)
    assert y.shape == (N, in_channels, 2 * H, 2 * W), y.shape
    err = float(jnp.max(jnp.abs(y - y_ref)))
    assert jnp.allclose(y, y_ref, atol=1e-4, rtol=1e-4), err

    print("KERNEL_OK")
</pallas_src>

<mosaic_0001>
module attributes {stable_mosaic.version = 11 : i64} {
  func.func @_upsample_conv_kernel(%arg0: i32, %arg1: memref<4x6xf32, #tpu.memory_space<smem>>, %arg2: memref<2x6x16x16xf32, #tpu.memory_space<vmem>>, %arg3: memref<32x16xf32, #tpu.memory_space<vmem>>, %arg4: memref<64x128xf32, #tpu.memory_space<vmem>>, %arg5: memref<2x32x128xf32, #tpu.memory_space<vmem>>, %arg6: memref<16x128xf32, #tpu.memory_space<vmem>>, %arg7: memref<64x64xf32, #tpu.memory_space<vmem>>) attributes {dimension_semantics = [#tpu.dimension_semantics<parallel>], iteration_bounds = array<i64: 1>, scalar_prefetch = 0 : i64, scratch_operands = 2 : i64, tpu.core_type = #tpu.core_type<tc>, window_params = [{transform_indices = @transform_0, window_bounds = array<i64: 4, 6>}, {transform_indices = @transform_1, window_bounds = array<i64: 2, 6, 16, 16>}, {pipeline_mode = #tpu.pipeline_mode<synchronous>, transform_indices = @transform_2, window_bounds = array<i64: 32, 16>}, {pipeline_mode = #tpu.pipeline_mode<synchronous>, transform_indices = @transform_3, window_bounds = array<i64: 64, 128>}, {transform_indices = @transform_4, window_bounds = array<i64: 2, 32, 128>}]} {
    %c0 = arith.constant 0 : index
    %c0_0 = arith.constant 0 : index
    %c0_1 = arith.constant 0 : index
    %c0_2 = arith.constant 0 : index
    %0 = vector.load %arg2[%c0, %c0_0, %c0_1, %c0_2] : memref<2x6x16x16xf32, #tpu.memory_space<vmem>>, vector<1x1x16x16xf32>
    %1 = vector.shape_cast %0 : vector<1x1x16x16xf32> to vector<16x16xf32>
    %c0_3 = arith.constant 0 : index
    %c1 = arith.constant 1 : index
    %c0_4 = arith.constant 0 : index
    %c0_5 = arith.constant 0 : index
    %2 = vector.load %arg2[%c0_3, %c1, %c0_4, %c0_5] : memref<2x6x16x16xf32, #tpu.memory_space<vmem>>, vector<1x1x16x16xf32>
    %3 = vector.shape_cast %2 : vector<1x1x16x16xf32> to vector<16x16xf32>
    %c0_6 = arith.constant 0 : index
    %c2 = arith.constant 2 : index
    %c0_7 = arith.constant 0 : index
    %c0_8 = arith.constant 0 : index
    %4 = vector.load %arg2[%c0_6, %c2, %c0_7, %c0_8] : memref<2x6x16x16xf32, #tpu.memory_space<vmem>>, vector<1x1x16x16xf32>
    %5 = vector.shape_cast %4 : vector<1x1x16x16xf32> to vector<16x16xf32>
    %c0_9 = arith.constant 0 : index
    %c3 = arith.constant 3 : index
    %c0_10 = arith.constant 0 : index
    %c0_11 = arith.constant 0 : index
    %6 = vector.load %arg2[%c0_9, %c3, %c0_10, %c0_11] : memref<2x6x16x16xf32, #tpu.memory_space<vmem>>, vector<1x1x16x16xf32>
    %7 = vector.shape_cast %6 : vector<1x1x16x16xf32> to vector<16x16xf32>
    %c0_12 = arith.constant 0 : index
    %c4 = arith.constant 4 : index
    %c0_13 = arith.constant 0 : index
    %c0_14 = arith.constant 0 : index
    %8 = vector.load %arg2[%c0_12, %c4, %c0_13, %c0_14] : memref<2x6x16x16xf32, #tpu.memory_space<vmem>>, vector<1x1x16x16xf32>
    %9 = vector.shape_cast %8 : vector<1x1x16x16xf32> to vector<16x16xf32>
    %c0_15 = arith.constant 0 : index
    %c5 = arith.constant 5 : index
    %c0_16 = arith.constant 0 : index
    %c0_17 = arith.constant 0 : index
    %10 = vector.load %arg2[%c0_15, %c5, %c0_16, %c0_17] : memref<2x6x16x16xf32, #tpu.memory_space<vmem>>, vector<1x1x16x16xf32>
    %11 = vector.shape_cast %10 : vector<1x1x16x16xf32> to vector<16x16xf32>
    %c0_18 = arith.constant 0 : index
    %c0_19 = arith.constant 0 : index
    %12 = memref.load %arg1[%c0_18, %c0_19] : memref<4x6xf32, #tpu.memory_space<smem>>
    %13 = vector.broadcast %12 : f32 to vector<16x16xf32>
    %14 = arith.mulf %13, %1 : vector<16x16xf32>
    %c0_20 = arith.constant 0 : index
    %c1_21 = arith.constant 1 : index
    %15 = memref.load %arg1[%c0_20, %c1_21] : memref<4x6xf32, #tpu.memory_space<smem>>
    %16 = vector.broadcast %15 : f32 to vector<16x16xf32>
    %17 = arith.mulf %16, %3 : vector<16x16xf32>
    %18 = arith.addf %14, %17 : vector<16x16xf32>
    %c0_22 = arith.constant 0 : index
    %c2_23 = arith.constant 2 : index
    %19 = memref.load %arg1[%c0_22, %c2_23] : memref<4x6xf32, #tpu.memory_space<smem>>
    %20 = vector.broadcast %19 : f32 to vector<16x16xf32>
    %21 = arith.mulf %20, %5 : vector<16x16xf32>
    %22 = arith.addf %18, %21 : vector<16x16xf32>
    %c0_24 = arith.constant 0 : index
    %c3_25 = arith.constant 3 : index
    %23 = memref.load %arg1[%c0_24, %c3_25] : memref<4x6xf32, #tpu.memory_space<smem>>
    %24 = vector.broadcast %23 : f32 to vector<16x16xf32>
    %25 = arith.mulf %24, %7 : vector<16x16xf32>
    %26 = arith.addf %22, %25 : vector<16x16xf32>
    %c0_26 = arith.constant 0 : index
    %c4_27 = arith.constant 4 : index
    %27 = memref.load %arg1[%c0_26, %c4_27] : memref<4x6xf32, #tpu.memory_space<smem>>
    %28 = vector.broadcast %27 : f32 to vector<16x16xf32>
    %29 = arith.mulf %28, %9 : vector<16x16xf32>
    %30 = arith.addf %26, %29 : vector<16x16xf32>
    %c0_28 = arith.constant 0 : index
    %c5_29 = arith.constant 5 : index
    %31 = memref.load %arg1[%c0_28, %c5_29] : memref<4x6xf32, #tpu.memory_space<smem>>
    %32 = vector.broadcast %31 : f32 to vector<16x16xf32>
    %33 = arith.mulf %32, %11 : vector<16x16xf32>
    %34 = arith.addf %30, %33 : vector<16x16xf32>
    %c0_30 = arith.constant 0 : index
    %c0_31 = arith.constant 0 : index
    %35 = vector.load %arg6[%c0_30, %c0_31] : memref<16x128xf32, #tpu.memory_space<vmem>>, vector<16x16xf32>
    tpu.vector_store %arg6[%c0_30, %c0_31], %34 {strides = array<i32>} : memref<16x128xf32, #tpu.memory_space<vmem>>, vector<16x16xf32>,
    %c1_32 = arith.constant 1 : index
    %c0_33 = arith.constant 0 : index
    %36 = memref.load %arg1[%c1_32, %c0_33] : memref<4x6xf32, #tpu.memory_space<smem>>
    %37 = vector.broadcast %36 : f32 to vector<16x16xf32>
    %38 = arith.mulf %37, %1 : vector<16x16xf32>
    %c1_34 = arith.constant 1 : index
    %c1_35 = arith.constant 1 : index
    %39 = memref.load %arg1[%c1_34, %c1_35] : memref<4x6xf32, #tpu.memory_space<smem>>
    %40 = vector.broadcast %39 : f32 to vector<16x16xf32>
    %41 = arith.mulf %40, %3 : vector<16x16xf32>
    %42 = arith.addf %38, %41 : vector<16x16xf32>
    %c1_36 = arith.constant 1 : index
    %c2_37 = arith.constant 2 : index
    %43 = memref.load %arg1[%c1_36, %c2_37] : memref<4x6xf32, #tpu.memory_space<smem>>
    %44 = vector.broadcast %43 : f32 to vector<16x16xf32>
    %45 = arith.mulf %44, %5 : vector<16x16xf32>
    %46 = arith.addf %42, %45 : vector<16x16xf32>
    %c1_38 = arith.constant 1 : index
    %c3_39 = arith.constant 3 : index
    %47 = memref.load %arg1[%c1_38, %c3_39] : memref<4x6xf32, #tpu.memory_space<smem>>
    %48 = vector.broadcast %47 : f32 to vector<16x16xf32>
    %49 = arith.mulf %48, %7 : vector<16x16xf32>
    %50 = arith.addf %46, %49 : vector<16x16xf32>
    %c1_40 = arith.constant 1 : index
    %c4_41 = arith.constant 4 : index
    %51 = memref.load %arg1[%c1_40, %c4_41] : memref<4x6xf32, #tpu.memory_space<smem>>
    %52 = vector.broadcast %51 : f32 to vector<16x16xf32>
    %53 = arith.mulf %52, %9 : vector<16x16xf32>
    %54 = arith.addf %50, %53 : vector<16x16xf32>
    %c1_42 = arith.constant 1 : index
    %c5_43 = arith.constant 5 : index
    %55 = memref.load %arg1[%c1_42, %c5_43] : memref<4x6xf32, #tpu.memory_space<smem>>
    %56 = vector.broadcast %55 : f32 to vector<16x16xf32>
    %57 = arith.mulf %56, %11 : vector<16x16xf32>
    %58 = arith.addf %54, %57 : vector<16x16xf32>
    %c0_44 = arith.constant 0 : index
    %c16 = arith.constant 16 : index
    %59 = vector.load %arg6[%c0_44, %c16] : memref<16x128xf32, #tpu.memory_space<vmem>>, vector<16x16xf32>
    tpu.vector_store %arg6[%c0_44, %c16], %58 {strides = array<i32>} : memref<16x128xf32, #tpu.memory_space<vmem>>, vector<16x16xf32>,
    %c2_45 = arith.constant 2 : index
    %c0_46 = arith.constant 0 : index
    %60 = memref.load %arg1[%c2_45, %c0_46] : memref<4x6xf32, #tpu.memory_space<smem>>
    %61 = vector.broadcast %60 : f32 to vector<16x16xf32>
    %62 = arith.mulf %61, %1 : vector<16x16xf32>
    %c2_47 = arith.constant 2 : index
    %c1_48 = arith.constant 1 : index
    %63 = memref.load %arg1[%c2_47, %c1_48] : memref<4x6xf32, #tpu.memory_space<smem>>
    %64 = vector.broadcast %63 : f32 to vector<16x16xf32>
    %65 = arith.mulf %64, %3 : vector<16x16xf32>
    %66 = arith.addf %62, %65 : vector<16x16xf32>
    %c2_49 = arith.constant 2 : index
    %c2_50 = arith.constant 2 : index
    %67 = memref.load %arg1[%c2_49, %c2_50] : memref<4x6xf32, #tpu.memory_space<smem>>
    %68 = vector.broadcast %67 : f32 to vector<16x16xf32>
    %69 = arith.mulf %68, %5 : vector<16x16xf32>
    %70 = arith.addf %66, %69 : vector<16x16xf32>
    %c2_51 = arith.constant 2 : index
    %c3_52 = arith.constant 3 : index
    %71 = memref.load %arg1[%c2_51, %c3_52] : memref<4x6xf32, #tpu.memory_space<smem>>
    %72 = vector.broadcast %71 : f32 to vector<16x16xf32>
    %73 = arith.mulf %72, %7 : vector<16x16xf32>
    %74 = arith.addf %70, %73 : vector<16x16xf32>
    %c2_53 = arith.constant 2 : index
    %c4_54 = arith.constant 4 : index
    %75 = memref.load %arg1[%c2_53, %c4_54] : memref<4x6xf32, #tpu.memory_space<smem>>
    %76 = vector.broadcast %75 : f32 to vector<16x16xf32>
    %77 = arith.mulf %76, %9 : vector<16x16xf32>
    %78 = arith.addf %74, %77 : vector<16x16xf32>
    %c2_55 = arith.constant 2 : index
    %c5_56 = arith.constant 5 : index
    %79 = memref.load %arg1[%c2_55, %c5_56] : memref<4x6xf32, #tpu.memory_space<smem>>
    %80 = vector.broadcast %79 : f32 to vector<16x16xf32>
    %81 = arith.mulf %80, %11 : vector<16x16xf32>
    %82 = arith.addf %78, %81 : vector<16x16xf32>
    %c0_57 = arith.constant 0 : index
    %c32 = arith.constant 32 : index
    %83 = vector.load %arg6[%c0_57, %c32] : memref<16x128xf32, #tpu.memory_space<vmem>>, vector<16x16xf32>
    tpu.vector_store %arg6[%c0_57, %c32], %82 {strides = array<i32>} : memref<16x128xf32, #tpu.memory_space<vmem>>, vector<16x16xf32>,
    %c3_58 = arith.constant 3 : index
    %c0_59 = arith.constant 0 : index
    %84 = memref.load %arg1[%c3_58, %c0_59] : memref<4x6xf32, #tpu.memory_space<smem>>
    %85 = vector.broadcast %84 : f32 to vector<16x16xf32>
    %86 = arith.mulf %85, %1 : vector<16x16xf32>
    %c3_60 = arith.constant 3 : index
    %c1_61 = arith.constant 1 : index
    %87 = memref.load %arg1[%c3_60, %c1_61] : memref<4x6xf32, #tpu.memory_space<smem>>
    %88 = vector.broadcast %87 : f32 to vector<16x16xf32>
    %89 = arith.mulf %88, %3 : vector<16x16xf32>
    %90 = arith.addf %86, %89 : vector<16x16xf32>
    %c3_62 = arith.constant 3 : index
    %c2_63 = arith.constant 2 : index
    %91 = memref.load %arg1[%c3_62, %c2_63] : memref<4x6xf32, #tpu.memory_space<smem>>
    %92 = vector.broadcast %91 : f32 to vector<16x16xf32>
    %93 = arith.mulf %92, %5 : vector<16x16xf32>
    %94 = arith.addf %90, %93 : vector<16x16xf32>
    %c3_64 = arith.constant 3 : index
    %c3_65 = arith.constant 3 : index
    %95 = memref.load %arg1[%c3_64, %c3_65] : memref<4x6xf32, #tpu.memory_space<smem>>
    %96 = vector.broadcast %95 : f32 to vector<16x16xf32>
    %97 = arith.mulf %96, %7 : vector<16x16xf32>
    %98 = arith.addf %94, %97 : vector<16x16xf32>
    %c3_66 = arith.constant 3 : index
    %c4_67 = arith.constant 4 : index
    %99 = memref.load %arg1[%c3_66, %c4_67] : memref<4x6xf32, #tpu.memory_space<smem>>
    %100 = vector.broadcast %99 : f32 to vector<16x16xf32>
    %101 = arith.mulf %100, %9 : vector<16x16xf32>
    %102 = arith.addf %98, %101 : vector<16x16xf32>
    %c3_68 = arith.constant 3 : index
    %c5_69 = arith.constant 5 : index
    %103 = memref.load %arg1[%c3_68, %c5_69] : memref<4x6xf32, #tpu.memory_space<smem>>
    %104 = vector.broadcast %103 : f32 to vector<16x16xf32>
    %105 = arith.mulf %104, %11 : vector<16x16xf32>
    %106 = arith.addf %102, %105 : vector<16x16xf32>
    %c0_70 = arith.constant 0 : index
    %c48 = arith.constant 48 : index
    %107 = vector.load %arg6[%c0_70, %c48] : memref<16x128xf32, #tpu.memory_space<vmem>>, vector<16x16xf32>
    tpu.vector_store %arg6[%c0_70, %c48], %106 {strides = array<i32>} : memref<16x128xf32, #tpu.memory_space<vmem>>, vector<16x16xf32>,
    %c1_71 = arith.constant 1 : index
    %c0_72 = arith.constant 0 : index
    %c0_73 = arith.constant 0 : index
    %c0_74 = arith.constant 0 : index
    %108 = vector.load %arg2[%c1_71, %c0_72, %c0_73, %c0_74] : memref<2x6x16x16xf32, #tpu.memory_space<vmem>>, vector<1x1x16x16xf32>
    %109 = vector.shape_cast %108 : vector<1x1x16x16xf32> to vector<16x16xf32>
    %c1_75 = arith.constant 1 : index
    %c1_76 = arith.constant 1 : index
    %c0_77 = arith.constant 0 : index
    %c0_78 = arith.constant 0 : index
    %110 = vector.load %arg2[%c1_75, %c1_76, %c0_77, %c0_78] : memref<2x6x16x16xf32, #tpu.memory_space<vmem>>, vector<1x1x16x16xf32>
    %111 = vector.shape_cast %110 : vector<1x1x16x16xf32> to vector<16x16xf32>
    %c1_79 = arith.constant 1 : index
    %c2_80 = arith.constant 2 : index
    %c0_81 = arith.constant 0 : index
    %c0_82 = arith.constant 0 : index
    %112 = vector.load %arg2[%c1_79, %c2_80, %c0_81, %c0_82] : memref<2x6x16x16xf32, #tpu.memory_space<vmem>>, vector<1x1x16x16xf32>
    %113 = vector.shape_cast %112 : vector<1x1x16x16xf32> to vector<16x16xf32>
    %c1_83 = arith.constant 1 : index
    %c3_84 = arith.constant 3 : index
    %c0_85 = arith.constant 0 : index
    %c0_86 = arith.constant 0 : index
    %114 = vector.load %arg2[%c1_83, %c3_84, %c0_85, %c0_86] : memref<2x6x16x16xf32, #tpu.memory_space<vmem>>, vector<1x1x16x16xf32>
    %115 = vector.shape_cast %114 : vector<1x1x16x16xf32> to vector<16x16xf32>
    %c1_87 = arith.constant 1 : index
    %c4_88 = arith.constant 4 : index
    %c0_89 = arith.constant 0 : index
    %c0_90 = arith.constant 0 : index
    %116 = vector.load %arg2[%c1_87, %c4_88, %c0_89, %c0_90] : memref<2x6x16x16xf32, #tpu.memory_space<vmem>>, vector<1x1x16x16xf32>
    %117 = vector.shape_cast %116 : vector<1x1x16x16xf32> to vector<16x16xf32>
    %c1_91 = arith.constant 1 : index
    %c5_92 = arith.constant 5 : index
    %c0_93 = arith.constant 0 : index
    %c0_94 = arith.constant 0 : index
    %118 = vector.load %arg2[%c1_91, %c5_92, %c0_93, %c0_94] : memref<2x6x16x16xf32, #tpu.memory_space<vmem>>, vector<1x1x16x16xf32>
    %119 = vector.shape_cast %118 : vector<1x1x16x16xf32> to vector<16x16xf32>
    %c0_95 = arith.constant 0 : index
    %c0_96 = arith.constant 0 : index
    %120 = memref.load %arg1[%c0_95, %c0_96] : memref<4x6xf32, #tpu.memory_space<smem>>
    %121 = vector.broadcast %120 : f32 to vector<16x16xf32>
    %122 = arith.mulf %121, %109 : vector<16x16xf32>
    %c0_97 = arith.constant 0 : index
    %c1_98 = arith.constant 1 : index
    %123 = memref.load %arg1[%c0_97, %c1_98] : memref<4x6xf32, #tpu.memory_space<smem>>
    %124 = vector.broadcast %123 : f32 to vector<16x16xf32>
    %125 = arith.mulf %124, %111 : vector<16x16xf32>
    %126 = arith.addf %122, %125 : vector<16x16xf32>
    %c0_99 = arith.constant 0 : index
    %c2_100 = arith.constant 2 : index
    %127 = memref.load %arg1[%c0_99, %c2_100] : memref<4x6xf32, #tpu.memory_space<smem>>
    %128 = vector.broadcast %127 : f32 to vector<16x16xf32>
    %129 = arith.mulf %128, %113 : vector<16x16xf32>
    %130 = arith.addf %126, %129 : vector<16x16xf32>
    %c0_101 = arith.constant 0 : index
    %c3_102 = arith.constant 3 : index
    %131 = memref.load %arg1[%c0_101, %c3_102] : memref<4x6xf32, #tpu.memory_space<smem>>
    %132 = vector.broadcast %131 : f32 to vector<16x16xf32>
    %133 = arith.mulf %132, %115 : vector<16x16xf32>
    %134 = arith.addf %130, %133 : vector<16x16xf32>
    %c0_103 = arith.constant 0 : index
    %c4_104 = arith.constant 4 : index
    %135 = memref.load %arg1[%c0_103, %c4_104] : memref<4x6xf32, #tpu.memory_space<smem>>
    %136 = vector.broadcast %135 : f32 to vector<16x16xf32>
    %137 = arith.mulf %136, %117 : vector<16x16xf32>
    %138 = arith.addf %134, %137 : vector<16x16xf32>
    %c0_105 = arith.constant 0 : index
    %c5_106 = arith.constant 5 : index
    %139 = memref.load %arg1[%c0_105, %c5_106] : memref<4x6xf32, #tpu.memory_space<smem>>
    %140 = vector.broadcast %139 : f32 to vector<16x16xf32>
    %141 = arith.mulf %140, %119 : vector<16x16xf32>
    %142 = arith.addf %138, %141 : vector<16x16xf32>
    %c0_107 = arith.constant 0 : index
    %c64 = arith.constant 64 : index
    %143 = vector.load %arg6[%c0_107, %c64] : memref<16x128xf32, #tpu.memory_space<vmem>>, vector<16x16xf32>
    tpu.vector_store %arg6[%c0_107, %c64], %142 {strides = array<i32>} : memref<16x128xf32, #tpu.memory_space<vmem>>, vector<16x16xf32>,
    %c1_108 = arith.constant 1 : index
    %c0_109 = arith.constant 0 : index
    %144 = memref.load %arg1[%c1_108, %c0_109] : memref<4x6xf32, #tpu.memory_space<smem>>
    %145 = vector.broadcast %144 : f32 to vector<16x16xf32>
    %146 = arith.mulf %145, %109 : vector<16x16xf32>
    %c1_110 = arith.constant 1 : index
    %c1_111 = arith.constant 1 : index
    %147 = memref.load %arg1[%c1_110, %c1_111] : memref<4x6xf32, #tpu.memory_space<smem>>
    %148 = vector.broadcast %147 : f32 to vector<16x16xf32>
    %149 = arith.mulf %148, %111 : vector<16x16xf32>
    %150 = arith.addf %146, %149 : vector<16x16xf32>
    %c1_112 = arith.constant 1 : index
    %c2_113 = arith.constant 2 : index
    %151 = memref.load %arg1[%c1_112, %c2_113] : memref<4x6xf32, #tpu.memory_space<smem>>
    %152 = vector.broadcast %151 : f32 to vector<16x16xf32>
    %153 = arith.mulf %152, %113 : vector<16x16xf32>
    %154 = arith.addf %150, %153 : vector<16x16xf32>
    %c1_114 = arith.constant 1 : index
    %c3_115 = arith.constant 3 : index
    %155 = memref.load %arg1[%c1_114, %c3_115] : memref<4x6xf32, #tpu.memory_space<smem>>
    %156 = vector.broadcast %155 : f32 to vector<16x16xf32>
    %157 = arith.mulf %156, %115 : vector<16x16xf32>
    %158 = arith.addf %154, %157 : vector<16x16xf32>
    %c1_116 = arith.constant 1 : index
    %c4_117 = arith.constant 4 : index
    %159 = memref.load %arg1[%c1_116, %c4_117] : memref<4x6xf32, #tpu.memory_space<smem>>
    %160 = vector.broadcast %159 : f32 to vector<16x16xf32>
    %161 = arith.mulf %160, %117 : vector<16x16xf32>
    %162 = arith.addf %158, %161 : vector<16x16xf32>
    %c1_118 = arith.constant 1 : index
    %c5_119 = arith.constant 5 : index
    %163 = memref.load %arg1[%c1_118, %c5_119] : memref<4x6xf32, #tpu.memory_space<smem>>
    %164 = vector.broadcast %163 : f32 to vector<16x16xf32>
    %165 = arith.mulf %164, %119 : vector<16x16xf32>
    %166 = arith.addf %162, %165 : vector<16x16xf32>
    %c0_120 = arith.constant 0 : index
    %c80 = arith.constant 80 : index
    %167 = vector.load %arg6[%c0_120, %c80] : memref<16x128xf32, #tpu.memory_space<vmem>>, vector<16x16xf32>
    tpu.vector_store %arg6[%c0_120, %c80], %166 {strides = array<i32>} : memref<16x128xf32, #tpu.memory_space<vmem>>, vector<16x16xf32>,
    %c2_121 = arith.constant 2 : index
    %c0_122 = arith.constant 0 : index
    %168 = memref.load %arg1[%c2_121, %c0_122] : memref<4x6xf32, #tpu.memory_space<smem>>
    %169 = vector.broadcast %168 : f32 to vector<16x16xf32>
    %170 = arith.mulf %169, %109 : vector<16x16xf32>
    %c2_123 = arith.constant 2 : index
    %c1_124 = arith.constant 1 : index
    %171 = memref.load %arg1[%c2_123, %c1_124] : memref<4x6xf32, #tpu.memory_space<smem>>
    %172 = vector.broadcast %171 : f32 to vector<16x16xf32>
    %173 = arith.mulf %172, %111 : vector<16x16xf32>
    %174 = arith.addf %170, %173 : vector<16x16xf32>
    %c2_125 = arith.constant 2 : index
    %c2_126 = arith.constant 2 : index
    %175 = memref.load %arg1[%c2_125, %c2_126] : memref<4x6xf32, #tpu.memory_space<smem>>
    %176 = vector.broadcast %175 : f32 to vector<16x16xf32>
    %177 = arith.mulf %176, %113 : vector<16x16xf32>
    %178 = arith.addf %174, %177 : vector<16x16xf32>
    %c2_127 = arith.constant 2 : index
    %c3_128 = arith.constant 3 : index
    %179 = memref.load %arg1[%c2_127, %c3_128] : memref<4x6xf32, #tpu.memory_space<smem>>
    %180 = vector.broadcast %179 : f32 to vector<16x16xf32>
    %181 = arith.mulf %180, %115 : vector<16x16xf32>
    %182 = arith.addf %178, %181 : vector<16x16xf32>
    %c2_129 = arith.constant 2 : index
    %c4_130 = arith.constant 4 : index
    %183 = memref.load %arg1[%c2_129, %c4_130] : memref<4x6xf32, #tpu.memory_space<smem>>
    %184 = vector.broadcast %183 : f32 to vector<16x16xf32>
    %185 = arith.mulf %184, %117 : vector<16x16xf32>
    %186 = arith.addf %182, %185 : vector<16x16xf32>
    %c2_131 = arith.constant 2 : index
    %c5_132 = arith.constant 5 : index
    %187 = memref.load %arg1[%c2_131, %c5_132] : memref<4x6xf32, #tpu.memory_space<smem>>
    %188 = vector.broadcast %187 : f32 to vector<16x16xf32>
    %189 = arith.mulf %188, %119 : vector<16x16xf32>
    %190 = arith.addf %186, %189 : vector<16x16xf32>
    %c0_133 = arith.constant 0 : index
    %c96 = arith.constant 96 : index
    %191 = vector.load %arg6[%c0_133, %c96] : memref<16x128xf32, #tpu.memory_space<vmem>>, vector<16x16xf32>
    tpu.vector_store %arg6[%c0_133, %c96], %190 {strides = array<i32>} : memref<16x128xf32, #tpu.memory_space<vmem>>, vector<16x16xf32>,
    %c3_134 = arith.constant 3 : index
    %c0_135 = arith.constant 0 : index
    %192 = memref.load %arg1[%c3_134, %c0_135] : memref<4x6xf32, #tpu.memory_space<smem>>
    %193 = vector.broadcast %192 : f32 to vector<16x16xf32>
    %194 = arith.mulf %193, %109 : vector<16x16xf32>
    %c3_136 = arith.constant 3 : index
    %c1_137 = arith.constant 1 : index
    %195 = memref.load %arg1[%c3_136, %c1_137] : memref<4x6xf32, #tpu.memory_space<smem>>
    %196 = vector.broadcast %195 : f32 to vector<16x16xf32>
    %197 = arith.mulf %196, %111 : vector<16x16xf32>
    %198 = arith.addf %194, %197 : vector<16x16xf32>
    %c3_138 = arith.constant 3 : index
    %c2_139 = arith.constant 2 : index
    %199 = memref.load %arg1[%c3_138, %c2_139] : memref<4x6xf32, #tpu.memory_space<smem>>
    %200 = vector.broadcast %199 : f32 to vector<16x16xf32>
    %201 = arith.mulf %200, %113 : vector<16x16xf32>
    %202 = arith.addf %198, %201 : vector<16x16xf32>
    %c3_140 = arith.constant 3 : index
    %c3_141 = arith.constant 3 : index
    %203 = memref.load %arg1[%c3_140, %c3_141] : memref<4x6xf32, #tpu.memory_space<smem>>
    %204 = vector.broadcast %203 : f32 to vector<16x16xf32>
    %205 = arith.mulf %204, %115 : vector<16x16xf32>
    %206 = arith.addf %202, %205 : vector<16x16xf32>
    %c3_142 = arith.constant 3 : index
    %c4_143 = arith.constant 4 : index
    %207 = memref.load %arg1[%c3_142, %c4_143] : memref<4x6xf32, #tpu.memory_space<smem>>
    %208 = vector.broadcast %207 : f32 to vector<16x16xf32>
    %209 = arith.mulf %208, %117 : vector<16x16xf32>
    %210 = arith.addf %206, %209 : vector<16x16xf32>
    %c3_144 = arith.constant 3 : index
    %c5_145 = arith.constant 5 : index
    %211 = memref.load %arg1[%c3_144, %c5_145] : memref<4x6xf32, #tpu.memory_space<smem>>
    %212 = vector.broadcast %211 : f32 to vector<16x16xf32>
    %213 = arith.mulf %212, %119 : vector<16x16xf32>
    %214 = arith.addf %210, %213 : vector<16x16xf32>
    %c0_146 = arith.constant 0 : index
    %c112 = arith.constant 112 : index
    %215 = vector.load %arg6[%c0_146, %c112] : memref<16x128xf32, #tpu.memory_space<vmem>>, vector<16x16xf32>
    tpu.vector_store %arg6[%c0_146, %c112], %214 {strides = array<i32>} : memref<16x128xf32, #tpu.memory_space<vmem>>, vector<16x16xf32>,
    %c0_147 = arith.constant 0 : index
    %c0_148 = arith.constant 0 : index
    %216 = vector.load %arg3[%c0_147, %c0_148] : memref<32x16xf32, #tpu.memory_space<vmem>>, vector<32x16xf32>
    %c0_149 = arith.constant 0 : index
    %c0_150 = arith.constant 0 : index
    %217 = vector.load %arg6[%c0_149, %c0_150] : memref<16x128xf32, #tpu.memory_space<vmem>>, vector<16x128xf32>
    %cst = arith.constant dense<0.000000e+00> : vector<32x128xf32>
    %218 = tpu.matmul %216, %217, %cst {dimension_numbers = #tpu.dot_dimension_numbers<[1], [0], [0], [1], [0, 0, 1, 1], [], []>} : vector<32x16xf32>, vector<16x128xf32>, vector<32x128xf32> -> vector<32x128xf32>
    %219 = vector.extract_strided_slice %218 {offsets = [0, 0], sizes = [8, 16], strides = [1, 1]} : vector<32x128xf32> to vector<8x16xf32>
    %c0_151 = arith.constant 0 : index
    %c0_152 = arith.constant 0 : index
    %220 = vector.load %arg7[%c0_151, %c0_152] : memref<64x64xf32, #tpu.memory_space<vmem>>, vector<8x16xf32>
    tpu.vector_store %arg7[%c0_151, %c0_152], %219 {strides = array<i32>} : memref<64x64xf32, #tpu.memory_space<vmem>>, vector<8x16xf32>,
    %221 = vector.extract_strided_slice %218 {offsets = [8, 0], sizes = [8, 16], strides = [1, 1]} : vector<32x128xf32> to vector<8x16xf32>
    %c0_153 = arith.constant 0 : index
    %c16_154 = arith.constant 16 : index
    %222 = vector.load %arg7[%c0_153, %c16_154] : memref<64x64xf32, #tpu.memory_space<vmem>>, vector<8x16xf32>
    tpu.vector_store %arg7[%c0_153, %c16_154], %221 {strides = array<i32>} : memref<64x64xf32, #tpu.memory_space<vmem>>, vector<8x16xf32>,
    %223 = vector.extract_strided_slice %218 {offsets = [16, 0], sizes = [8, 16], strides = [1, 1]} : vector<32x128xf32> to vector<8x16xf32>
    %c0_155 = arith.constant 0 : index
    %c32_156 = arith.constant 32 : index
    %224 = vector.load %arg7[%c0_155, %c32_156] : memref<64x64xf32, #tpu.memory_space<vmem>>, vector<8x16xf32>
    tpu.vector_store %arg7[%c0_155, %c32_156], %223 {strides = array<i32>} : memref<64x64xf32, #tpu.memory_space<vmem>>, vector<8x16xf32>,
    %225 = vector.extract_strided_slice %218 {offsets = [24, 0], sizes = [8, 16], strides = [1, 1]} : vector<32x128xf32> to vector<8x16xf32>
    %c0_157 = arith.constant 0 : index
    %c48_158 = arith.constant 48 : index
    %226 = vector.load %arg7[%c0_157, %c48_158] : memref<64x64xf32, #tpu.memory_space<vmem>>, vector<8x16xf32>
    tpu.vector_store %arg7[%c0_157, %c48_158], %225 {strides = array<i32>} : memref<64x64xf32, #tpu.memory_space<vmem>>, vector<8x16xf32>,
    %227 = vector.extract_strided_slice %218 {offsets = [0, 16], sizes = [8, 16], strides = [1, 1]} : vector<32x128xf32> to vector<8x16xf32>
    %c8 = arith.constant 8 : index
    %c0_159 = arith.constant 0 : index
    %228 = vector.load %arg7[%c8, %c0_159] : memref<64x64xf32, #tpu.memory_space<vmem>>, vector<8x16xf32>
    tpu.vector_store %arg7[%c8, %c0_159], %227 {strides = array<i32>} : memref<64x64xf32, #tpu.memory_space<vmem>>, vector<8x16xf32>,
    %229 = vector.extract_strided_slice %218 {offsets = [8, 16], sizes = [8, 16], strides = [1, 1]} : vector<32x128xf32> to vector<8x16xf32>
    %c8_160 = arith.constant 8 : index
    %c16_161 = arith.constant 16 : index
    %230 = vector.load %arg7[%c8_160, %c16_161] : memref<64x64xf32, #tpu.memory_space<vmem>>, vector<8x16xf32>
    tpu.vector_store %arg7[%c8_160, %c16_161], %229 {strides = array<i32>} : memref<64x64xf32, #tpu.memory_space<vmem>>, vector<8x16xf32>,
    %231 = vector.extract_strided_slice %218 {offsets = [16, 16], sizes = [8, 16], strides = [1, 1]} : vector<32x128xf32> to vector<8x16xf32>
    %c8_162 = arith.constant 8 : index
    %c32_163 = arith.constant 32 : index
    %232 = vector.load %arg7[%c8_162, %c32_163] : memref<64x64xf32, #tpu.memory_space<vmem>>, vector<8x16xf32>
    tpu.vector_store %arg7[%c8_162, %c32_163], %231 {strides = array<i32>} : memref<64x64xf32, #tpu.memory_space<vmem>>, vector<8x16xf32>,
    %233 = vector.extract_strided_slice %218 {offsets = [24, 16], sizes = [8, 16], strides = [1, 1]} : vector<32x128xf32> to vector<8x16xf32>
    %c8_164 = arith.constant 8 : index
    %c48_165 = arith.constant 48 : index
    %234 = vector.load %arg7[%c8_164, %c48_165] : memref<64x64xf32, #tpu.memory_space<vmem>>, vector<8x16xf32>
    tpu.vector_store %arg7[%c8_164, %c48_165], %233 {strides = array<i32>} : memref<64x64xf32, #tpu.memory_space<vmem>>, vector<8x16xf32>,
    %235 = vector.extract_strided_slice %218 {offsets = [0, 32], sizes = [8, 16], strides = [1, 1]} : vector<32x128xf32> to vector<8x16xf32>
    %c16_166 = arith.constant 16 : index
    %c0_167 = arith.constant 0 : index
    %236 = vector.load %arg7[%c16_166, %c0_167] : memref<64x64xf32, #tpu.memory_space<vmem>>, vector<8x16xf32>
    tpu.vector_store %arg7[%c16_166, %c0_167], %235 {strides = array<i32>} : memref<64x64xf32, #tpu.memory_space<vmem>>, vector<8x16xf32>,
    %237 = vector.extract_strided_slice %218 {offsets = [8, 32], sizes = [8, 16], strides = [1, 1]} : vector<32x128xf32> to vector<8x16xf32>
    %c16_168 = arith.constant 16 : index
    %c16_169 = arith.constant 16 : index
    %238 = vector.load %arg7[%c16_168, %c16_169] : memref<64x64xf32, #tpu.memory_space<vmem>>, vector<8x16xf32>
    tpu.vector_store %arg7[%c16_168, %c16_169], %237 {strides = array<i32>} : memref<64x64xf32, #tpu.memory_space<vmem>>, vector<8x16xf32>,
    %239 = vector.extract_strided_slice %218 {offsets = [16, 32], sizes = [8, 16], strides = [1, 1]} : vector<32x128xf32> to vector<8x16xf32>
    %c16_170 = arith.constant 16 : index
    %c32_171 = arith.constant 32 : index
    %240 = vector.load %arg7[%c16_170, %c32_171] : memref<64x64xf32, #tpu.memory_space<vmem>>, vector<8x16xf32>
    tpu.vector_store %arg7[%c16_170, %c32_171], %239 {strides = array<i32>} : memref<64x64xf32, #tpu.memory_space<vmem>>, vector<8x16xf32>,
    %241 = vector.extract_strided_slice %218 {offsets = [24, 32], sizes = [8, 16], strides = [1, 1]} : vector<32x128xf32> to vector<8x16xf32>
    %c16_172 = arith.constant 16 : index
    %c48_173 = arith.constant 48 : index
    %242 = vector.load %arg7[%c16_172, %c48_173] : memref<64x64xf32, #tpu.memory_space<vmem>>, vector<8x16xf32>
    tpu.vector_store %arg7[%c16_172, %c48_173], %241 {strides = array<i32>} : memref<64x64xf32, #tpu.memory_space<vmem>>, vector<8x16xf32>,
    %243 = vector.extract_strided_slice %218 {offsets = [0, 48], sizes = [8, 16], strides = [1, 1]} : vector<32x128xf32> to vector<8x16xf32>
    %c24 = arith.constant 24 : index
    %c0_174 = arith.constant 0 : index
    %244 = vector.load %arg7[%c24, %c0_174] : memref<64x64xf32, #tpu.memory_space<vmem>>, vector<8x16xf32>
    tpu.vector_store %arg7[%c24, %c0_174], %243 {strides = array<i32>} : memref<64x64xf32, #tpu.memory_space<vmem>>, vector<8x16xf32>,
    %245 = vector.extract_strided_slice %218 {offsets = [8, 48], sizes = [8, 16], strides = [1, 1]} : vector<32x128xf32> to vector<8x16xf32>
    %c24_175 = arith.constant 24 : index
    %c16_176 = arith.constant 16 : index
    %246 = vector.load %arg7[%c24_175, %c16_176] : memref<64x64xf32, #tpu.memory_space<vmem>>, vector<8x16xf32>
    tpu.vector_store %arg7[%c24_175, %c16_176], %245 {strides = array<i32>} : memref<64x64xf32, #tpu.memory_space<vmem>>, vector<8x16xf32>,
    %247 = vector.extract_strided_slice %218 {offsets = [16, 48], sizes = [8, 16], strides = [1, 1]} : vector<32x128xf32> to vector<8x16xf32>
    %c24_177 = arith.constant 24 : index
    %c32_178 = arith.constant 32 : index
    %248 = vector.load %arg7[%c24_177, %c32_178] : memref<64x64xf32, #tpu.memory_space<vmem>>, vector<8x16xf32>
    tpu.vector_store %arg7[%c24_177, %c32_178], %247 {strides = array<i32>} : memref<64x64xf32, #tpu.memory_space<vmem>>, vector<8x16xf32>,
    %249 = vector.extract_strided_slice %218 {offsets = [24, 48], sizes = [8, 16], strides = [1, 1]} : vector<32x128xf32> to vector<8x16xf32>
    %c24_179 = arith.constant 24 : index
    %c48_180 = arith.constant 48 : index
    %250 = vector.load %arg7[%c24_179, %c48_180] : memref<64x64xf32, #tpu.memory_space<vmem>>, vector<8x16xf32>
    tpu.vector_store %arg7[%c24_179, %c48_180], %249 {strides = array<i32>} : memref<64x64xf32, #tpu.memory_space<vmem>>, vector<8x16xf32>,
    %251 = vector.extract_strided_slice %218 {offsets = [0, 64], sizes = [8, 16], strides = [1, 1]} : vector<32x128xf32> to vector<8x16xf32>
    %c32_181 = arith.constant 32 : index
    %c0_182 = arith.constant 0 : index
    %252 = vector.load %arg7[%c32_181, %c0_182] : memref<64x64xf32, #tpu.memory_space<vmem>>, vector<8x16xf32>
    tpu.vector_store %arg7[%c32_181, %c0_182], %251 {strides = array<i32>} : memref<64x64xf32, #tpu.memory_space<vmem>>, vector<8x16xf32>,
    %253 = vector.extract_strided_slice %218 {offsets = [8, 64], sizes = [8, 16], strides = [1, 1]} : vector<32x128xf32> to vector<8x16xf32>
    %c32_183 = arith.constant 32 : index
    %c16_184 = arith.constant 16 : index
    %254 = vector.load %arg7[%c32_183, %c16_184] : memref<64x64xf32, #tpu.memory_space<vmem>>, vector<8x16xf32>
    tpu.vector_store %arg7[%c32_183, %c16_184], %253 {strides = array<i32>} : memref<64x64xf32, #tpu.memory_space<vmem>>, vector<8x16xf32>,
    %255 = vector.extract_strided_slice %218 {offsets = [16, 64], sizes = [8, 16], strides = [1, 1]} : vector<32x128xf32> to vector<8x16xf32>
    %c32_185 = arith.constant 32 : index
    %c32_186 = arith.constant 32 : index
    %256 = vector.load %arg7[%c32_185, %c32_186] : memref<64x64xf32, #tpu.memory_space<vmem>>, vector<8x16xf32>
    tpu.vector_store %arg7[%c32_185, %c32_186], %255 {strides = array<i32>} : memref<64x64xf32, #tpu.memory_space<vmem>>, vector<8x16xf32>,
    %257 = vector.extract_strided_slice %218 {offsets = [24, 64], sizes = [8, 16], strides = [1, 1]} : vector<32x128xf32> to vector<8x16xf32>
    %c32_187 = arith.constant 32 : index
    %c48_188 = arith.constant 48 : index
    %258 = vector.load %arg7[%c32_187, %c48_188] : memref<64x64xf32, #tpu.memory_space<vmem>>, vector<8x16xf32>
    tpu.vector_store %arg7[%c32_187, %c48_188], %257 {strides = array<i32>} : memref<64x64xf32, #tpu.memory_space<vmem>>, vector<8x16xf32>,
    %259 = vector.extract_strided_slice %218 {offsets = [0, 80], sizes = [8, 16], strides = [1, 1]} : vector<32x128xf32> to vector<8x16xf32>
    %c40 = arith.constant 40 : index
    %c0_189 = arith.constant 0 : index
    %260 = vector.load %arg7[%c40, %c0_189] : memref<64x64xf32, #tpu.memory_space<vmem>>, vector<8x16xf32>
    tpu.vector_store %arg7[%c40, %c0_189], %259 {strides = array<i32>} : memref<64x64xf32, #tpu.memory_space<vmem>>, vector<8x16xf32>,
    %261 = vector.extract_strided_slice %218 {offsets = [8, 80], sizes = [8, 16], strides = [1, 1]} : vector<32x128xf32> to vector<8x16xf32>
    %c40_190 = arith.constant 40 : index
    %c16_191 = arith.constant 16 : index
    %262 = vector.load %arg7[%c40_190, %c16_191] : memref<64x64xf32, #tpu.memory_space<vmem>>, vector<8x16xf32>
    tpu.vector_store %arg7[%c40_190, %c16_191], %261 {strides = array<i32>} : memref<64x64xf32, #tpu.memory_space<vmem>>, vector<8x16xf32>,
    %263 = vector.extract_strided_slice %218 {offsets = [16, 80], sizes = [8, 16], strides = [1, 1]} : vector<32x128xf32> to vector<8x16xf32>
    %c40_192 = arith.constant 40 : index
    %c32_193 = arith.constant 32 : index
    %264 = vector.load %arg7[%c40_192, %c32_193] : memref<64x64xf32, #tpu.memory_space<vmem>>, vector<8x16xf32>
    tpu.vector_store %arg7[%c40_192, %c32_193], %263 {strides = array<i32>} : memref<64x64xf32, #tpu.memory_space<vmem>>, vector<8x16xf32>,
    %265 = vector.extract_strided_slice %218 {offsets = [24, 80], sizes = [8, 16], strides = [1, 1]} : vector<32x128xf32> to vector<8x16xf32>
    %c40_194 = arith.constant 40 : index
    %c48_195 = arith.constant 48 : index
    %266 = vector.load %arg7[%c40_194, %c48_195] : memref<64x64xf32, #tpu.memory_space<vmem>>, vector<8x16xf32>
    tpu.vector_store %arg7[%c40_194, %c48_195], %265 {strides = array<i32>} : memref<64x64xf32, #tpu.memory_space<vmem>>, vector<8x16xf32>,
    %267 = vector.extract_strided_slice %218 {offsets = [0, 96], sizes = [8, 16], strides = [1, 1]} : vector<32x128xf32> to vector<8x16xf32>
    %c48_196 = arith.constant 48 : index
    %c0_197 = arith.constant 0 : index
    %268 = vector.load %arg7[%c48_196, %c0_197] : memref<64x64xf32, #tpu.memory_space<vmem>>, vector<8x16xf32>
    tpu.vector_store %arg7[%c48_196, %c0_197], %267 {strides = array<i32>} : memref<64x64xf32, #tpu.memory_space<vmem>>, vector<8x16xf32>,
    %269 = vector.extract_strided_slice %218 {offsets = [8, 96], sizes = [8, 16], strides = [1, 1]} : vector<32x128xf32> to vector<8x16xf32>
    %c48_198 = arith.constant 48 : index
    %c16_199 = arith.constant 16 : index
    %270 = vector.load %arg7[%c48_198, %c16_199] : memref<64x64xf32, #tpu.memory_space<vmem>>, vector<8x16xf32>
    tpu.vector_store %arg7[%c48_198, %c16_199], %269 {strides = array<i32>} : memref<64x64xf32, #tpu.memory_space<vmem>>, vector<8x16xf32>,
    %271 = vector.extract_strided_slice %218 {offsets = [16, 96], sizes = [8, 16], strides = [1, 1]} : vector<32x128xf32> to vector<8x16xf32>
    %c48_200 = arith.constant 48 : index
    %c32_201 = arith.constant 32 : index
    %272 = vector.load %arg7[%c48_200, %c32_201] : memref<64x64xf32, #tpu.memory_space<vmem>>, vector<8x16xf32>
    tpu.vector_store %arg7[%c48_200, %c32_201], %271 {strides = array<i32>} : memref<64x64xf32, #tpu.memory_space<vmem>>, vector<8x16xf32>,
    %273 = vector.extract_strided_slice %218 {offsets = [24, 96], sizes = [8, 16], strides = [1, 1]} : vector<32x128xf32> to vector<8x16xf32>
    %c48_202 = arith.constant 48 : index
    %c48_203 = arith.constant 48 : index
    %274 = vector.load %arg7[%c48_202, %c48_203] : memref<64x64xf32, #tpu.memory_space<vmem>>, vector<8x16xf32>
    tpu.vector_store %arg7[%c48_202, %c48_203], %273 {strides = array<i32>} : memref<64x64xf32, #tpu.memory_space<vmem>>, vector<8x16xf32>,
    %275 = vector.extract_strided_slice %218 {offsets = [0, 112], sizes = [8, 16], strides = [1, 1]} : vector<32x128xf32> to vector<8x16xf32>
    %c56 = arith.constant 56 : index
    %c0_204 = arith.constant 0 : index
    %276 = vector.load %arg7[%c56, %c0_204] : memref<64x64xf32, #tpu.memory_space<vmem>>, vector<8x16xf32>
    tpu.vector_store %arg7[%c56, %c0_204], %275 {strides = array<i32>} : memref<64x64xf32, #tpu.memory_space<vmem>>, vector<8x16xf32>,
    %277 = vector.extract_strided_slice %218 {offsets = [8, 112], sizes = [8, 16], strides = [1, 1]} : vector<32x128xf32> to vector<8x16xf32>
    %c56_205 = arith.constant 56 : index
    %c16_206 = arith.constant 16 : index
    %278 = vector.load %arg7[%c56_205, %c16_206] : memref<64x64xf32, #tpu.memory_space<vmem>>, vector<8x16xf32>
    tpu.vector_store %arg7[%c56_205, %c16_206], %277 {strides = array<i32>} : memref<64x64xf32, #tpu.memory_space<vmem>>, vector<8x16xf32>,
    %279 = vector.extract_strided_slice %218 {offsets = [16, 112], sizes = [8, 16], strides = [1, 1]} : vector<32x128xf32> to vector<8x16xf32>
    %c56_207 = arith.constant 56 : index
    %c32_208 = arith.constant 32 : index
    %280 = vector.load %arg7[%c56_207, %c32_208] : memref<64x64xf32, #tpu.memory_space<vmem>>, vector<8x16xf32>
    tpu.vector_store %arg7[%c56_207, %c32_208], %279 {strides = array<i32>} : memref<64x64xf32, #tpu.memory_space<vmem>>, vector<8x16xf32>,
    %281 = vector.extract_strided_slice %218 {offsets = [24, 112], sizes = [8, 16], strides = [1, 1]} : vector<32x128xf32> to vector<8x16xf32>
    %c56_209 = arith.constant 56 : index
    %c48_210 = arith.constant 48 : index
    %282 = vector.load %arg7[%c56_209, %c48_210] : memref<64x64xf32, #tpu.memory_space<vmem>>, vector<8x16xf32>
    tpu.vector_store %arg7[%c56_209, %c48_210], %281 {strides = array<i32>} : memref<64x64xf32, #tpu.memory_space<vmem>>, vector<8x16xf32>,
    %c0_211 = arith.constant 0 : index
    %c0_212 = arith.constant 0 : index
    %283 = vector.load %arg7[%c0_211, %c0_212] : memref<64x64xf32, #tpu.memory_space<vmem>>, vector<64x64xf32>
    %c0_213 = arith.constant 0 : index
    %c0_214 = arith.constant 0 : index
    %284 = vector.load %arg4[%c0_213, %c0_214] : memref<64x128xf32, #tpu.memory_space<vmem>>, vector<64x128xf32>
    %cst_215 = arith.constant dense<0.000000e+00> : vector<64x128xf32>
    %285 = tpu.matmul %283, %284, %cst_215 {dimension_numbers = #tpu.dot_dimension_numbers<[1], [0], [0], [1], [0, 0, 1, 1], [], []>} : vector<64x64xf32>, vector<64x128xf32>, vector<64x128xf32> -> vector<64x128xf32>
    %286 = vector.extract_strided_slice %285 {offsets = [0, 0], sizes = [32, 128], strides = [1, 1]} : vector<64x128xf32> to vector<32x128xf32>
    %c0_216 = arith.constant 0 : index
    %c0_217 = arith.constant 0 : index
    %c0_218 = arith.constant 0 : index
    %287 = vector.load %arg5[%c0_216, %c0_217, %c0_218] : memref<2x32x128xf32, #tpu.memory_space<vmem>>, vector<1x32x128xf32>
    %288 = vector.shape_cast %287 : vector<1x32x128xf32> to vector<32x128xf32>
    %289 = vector.shape_cast %286 : vector<32x128xf32> to vector<1x32x128xf32>
    tpu.vector_store %arg5[%c0_216, %c0_217, %c0_218], %289 {strides = array<i32>} : memref<2x32x128xf32, #tpu.memory_space<vmem>>, vector<1x32x128xf32>,
    %290 = vector.extract_strided_slice %285 {offsets = [32, 0], sizes = [32, 128], strides = [1, 1]} : vector<64x128xf32> to vector<32x128xf32>
    %c1_219 = arith.constant 1 : index
    %c0_220 = arith.constant 0 : index
    %c0_221 = arith.constant 0 : index
    %291 = vector.load %arg5[%c1_219, %c0_220, %c0_221] : memref<2x32x128xf32, #tpu.memory_space<vmem>>, vector<1x32x128xf32>
    %292 = vector.shape_cast %291 : vector<1x32x128xf32> to vector<32x128xf32>
    %293 = vector.shape_cast %290 : vector<32x128xf32> to vector<1x32x128xf32>
    tpu.vector_store %arg5[%c1_219, %c0_220, %c0_221], %293 {strides = array<i32>} : memref<2x32x128xf32, #tpu.memory_space<vmem>>, vector<1x32x128xf32>,
    return
  }
  func.func @transform_0(%arg0: i32) -> (i32, i32) {
    %c0_i32 = arith.constant 0 : i32
    %c0_i32_0 = arith.constant 0 : i32
    %c0_i32_1 = arith.constant 0 : i32
    return %c0_i32, %c0_i32_0 : i32, i32
  }
  func.func @transform_1(%arg0: i32) -> (i32, i32, i32, i32) {
    %c0_i32 = arith.constant 0 : i32
    %c0_i32_0 = arith.constant 0 : i32
    %c0_i32_1 = arith.constant 0 : i32
    %c0_i32_2 = arith.constant 0 : i32
    return %arg0, %c0_i32, %c0_i32_0, %c0_i32_1 : i32, i32, i32, i32
  }
  func.func @transform_2(%arg0: i32) -> (i32, i32) {
    %c0_i32 = arith.constant 0 : i32
    %c0_i32_0 = arith.constant 0 : i32
    %c0_i32_1 = arith.constant 0 : i32
    return %c0_i32, %c0_i32_0 : i32, i32
  }
  func.func @transform_3(%arg0: i32) -> (i32, i32) {
    %c0_i32 = arith.constant 0 : i32
    %c0_i32_0 = arith.constant 0 : i32
    %c0_i32_1 = arith.constant 0 : i32
    return %c0_i32, %c0_i32_0 : i32, i32
  }
  func.func @transform_4(%arg0: i32) -> (i32, i32, i32) {
    %c0_i32 = arith.constant 0 : i32
    %c0_i32_0 = arith.constant 0 : i32
    %c0_i32_1 = arith.constant 0 : i32
    return %arg0, %c0_i32, %c0_i32_0 : i32, i32, i32
  }
}

</mosaic_0001>

<bundles_post_ra>
// kernel: run.1
= control target key start
LH: loop header
LB: loop body
LE: loop exit
PB: predicated region body
PF: predicated region fallthrough
CT: control target
= control target key end

     0   :  { %9 = vsyncpa [#allocation6], 0  ;;  %s1428_s0 = inlined_call_operand.hbm [shape: f32[4,6], index: 0, kind: input, shape index: {}]   ;;  %s1429_s1 = inlined_call_operand.hbm [shape: f32[2,6,16,16], index: 1, kind: input, shape index: {}]   ;;  %s1430_s2 = inlined_call_operand.hbm [shape: f32[32,16], index: 2, kind: input, shape index: {}]   ;;  %s1431_s3 = inlined_call_operand.hbm [shape: f32[64,128], index: 3, kind: input, shape index: {}]   ;;  %s1432_s4 = inlined_call_operand.vmem [shape: f32[2,32,128], index: 4, kind: output, shape index: {}]  }
   0x1   :  { %10 = vsyncpa [#allocation5], 0 }
   0x2   :  { %11 = vsyncpa [#allocation9], 0  ;;  %s38_s17 = sshll.u32 %s1430_s2, 4  ;;  %s910_s18 = smov [#allocation8]   ;;  %s39_s17 = int_to_ptr.hbm [resolvable:$true] %s38_s17 }
   0x3   :  { %s40_s19 = sshll.u32 %s910_s18, 4  ;;  %s17_s22 = sshll.u32 %s1428_s0, 4  ;;  %s41_s19 = int_to_ptr.vmem [resolvable:$true] %s40_s19  ;;  %s18_s22 = int_to_ptr.hbm [resolvable:$true] %s17_s22 }
   0x4   :  { %s911_s23 = smov 128   ;;  %s912_s24 = smov 8  }
   0x5   :  { %46 = dma.hbm_to_vmem [thread:$0]  %s39_s17, 512, %s41_s19, [#allocation9], %s911_s23, %s911_s23, %s912_s24  }
   0x6   :  { %s913_s25 = smov [#allocation4]   ;;  %s25_s28 = sshll.u32 %s1429_s1, 4  ;;  %s26_s28 = int_to_ptr.hbm [resolvable:$true] %s25_s28 }
   0x7   :  { %20 = dma.hbm_to_smem %s18_s22, 64, %s913_s25, [#allocation6]  }
   0x8   :  { %s914_s2 = smov [#allocation7]   ;;  %s51_s6 = sshll.u32 %s1431_s3, 4  ;;  %s52_s6 = int_to_ptr.hbm [resolvable:$true] %s51_s6 }
   0x9   :  { %s27_s29 = sshll.u32 %s914_s2, 4  ;;  %s915_s0 = smov [#allocation10]   ;;  %s28_s29 = int_to_ptr.vmem [resolvable:$true] %s27_s29 }
   0xa   :  { %33 = dma.hbm_to_vmem [thread:$0]  %s26_s28, 3072, %s28_s29, [#allocation5], %s911_s23, %s911_s23, %s912_s24  }
   0xb   :  { %s53_s7 = sshll.u32 %s915_s0, 4  ;;  %s54_s7 = int_to_ptr.vmem [resolvable:$true] %s53_s7 }
   0xc   :  { %59 = dma.hbm_to_vmem [thread:$0]  %s52_s6, 1024, %s54_s7, [#allocation9], %s911_s23, %s911_s23, %s912_s24  }
   0xd   :  { %904 = dma.done.wait [#allocation6], 64  }
   0xe   :  { %905 = vsyncadd [#allocation6], 4294967232 }
   0xf   :  { %906 = dma.done.wait [#allocation5], 3072  }
  0x10   :  { %907 = vsyncadd [#allocation5], 4294964224 }
  0x11   :  { %908 = dma.done.wait [#allocation9], 1536  }
  0x12   :  { %909 = vsyncadd [#allocation9], 4294965760 }
  0x13   :  { %76 = sfence }
  0x14   :  { %s734_s1 = sld [smem:[#allocation4 + $0x80]]  ;;  %v960_v0 = vld [vmem:[#allocation7 + $0x8] sm:$0xff]  ;;  %v964_v1 = vld [vmem:[#allocation7] sm:$0xff]  ;;  %v966_v2 = vld [vmem:[#allocation7 + $0x18] sm:$0xff]  ;;  %s916_s24 = smov 16   ;;  %vm128_vm0 = vcmask 130048  }
  0x15   :  { %s735_s8 = sld [smem:[#allocation4 + $0x81]]  ;;  %v970_v3 = vld [vmem:[#allocation7 + $0x10] sm:$0xff]  ;;  %v972_v4 = vld [vmem:[#allocation7 + $0x68] sm:$0xff]  ;;  %v978_v7 = vld [vmem:[#allocation7 + $0x20] sm:$0xff]  ;;  %s917_s25 = smov 32   ;;  %vm173_vm1 = vcmask 261248  }
  0x16   :  { %s736_s9 = sld [smem:[#allocation4 + $0x82]]  ;;  %v974_v5 = vld [vmem:[#allocation7 + $0x28] sm:$0xff]  ;;  %v982_v8 = vld [vmem:[#allocation7 + $0x78] sm:$0xff]  ;;  %v1000_v16 = vld [vmem:[#allocation7 + $0x30] sm:$0xff]  ;;  %s918_s2 = smov 48   ;;  %vm218_vm2 = vcmask 392448  }
  0x17   :  { %s737_s10 = sld [smem:[#allocation4 + $0x83]]  ;;  %v984_v9 = vld [vmem:[#allocation7 + $0x38] sm:$0xff]  ;;  %v994_v13 = vld [vmem:[#allocation7 + $0x48] sm:$0xff]  ;;  %v1016_v23 = vld [vmem:[#allocation7 + $0x40] sm:$0xff]  ;;  %s919_s6 = smov 80   ;;  %vm263_vm3 = vcmask 523648  }
  0x18   :  { %s962_s3 = sld [smem:[#allocation4 + $0x84]]  ;;  %v1006_v18 = vld [vmem:[#allocation7 + $0x88] sm:$0xff]  ;;  %v1010_v20 = vld [vmem:[#allocation7 + $0x58] sm:$0xff]  ;;  %v1029_v29 = vld [vmem:[#allocation7 + $0x50] sm:$0xff]  ;;  %s920_s0 = smov 96   ;;  %vm326_vm4 = vcmask 654848  }
  0x19   :  { %s968_s11 = sld [smem:[#allocation4 + $0x85]]  ;;  %v1050_v39 = vld [vmem:[#allocation7 + $0x98] sm:$0xff]  ;;  %v1066_v48 = vld [vmem:[#allocation7 + $0xa8] sm:$0xff]  ;;  %s921_s7 = smov 64   ;;  %vm371_vm5 = vcmask 786048   ;;  %vm416_vm6 = vcmask 917248  }
  0x1a   :  { %v976_v6 = vstv %s734_s1  ;;  %s980_s12 = sld [smem:[#allocation4 + $0x100]]  ;;  %s922_s1 = smov 112   ;;  %vm461_vm7 = vcmask 1048448   ;;  %vm647_vm8 = vcmask 523264  }
  0x1b   :  { %v134_v10 = vmul.f32 %v976_v6, %v960_v0  ;;  %v988_v11 = vstv %s735_s8  ;;  %v133_v12 = vmul.f32 %v976_v6, %v964_v1  ;;  %s992_s13 = sld [smem:[#allocation4 + $0x101]]  ;;  %v332_v19 = vmul.f32 %v972_v4, %v976_v6 }
  0x1c   :  { %v138_v14 = vmul.f32 %v988_v11, %v966_v2  ;;  %v998_v15 = vstv %s736_s9  ;;  %v137_v17 = vmul.f32 %v988_v11, %v970_v3  ;;  %s1004_s14 = sld [smem:[#allocation4 + $0x102]]  ;;  %v336_v25 = vmul.f32 %v982_v8, %v988_v11 }
  0x1d   :  { %v144_v21 = vmul.f32 %v998_v15, %v974_v5  ;;  %v1014_v22 = vstv %s737_s10  ;;  %v143_v24 = vmul.f32 %v998_v15, %v978_v7  ;;  %s1020_s15 = sld [smem:[#allocation4 + $0x103]]  ;;  %v342_v34 = vmul.f32 %v1006_v18, %v998_v15 }
  0x1e   :  { %v140_v26 = vadd.f32 %v138_v14, %v134_v10  ;;  %v150_v27 = vmul.f32 %v1014_v22, %v984_v9  ;;  %v1027_v28 = vstv %s962_s3  ;;  %v139_v30 = vadd.f32 %v137_v17, %v133_v12  ;;  %s1031_s16 = sld [smem:[#allocation4 + $0x104]] }
  0x1f   :  { %v156_v31 = vmul.f32 %v1027_v28, %v994_v13  ;;  %v1036_v32 = vstv %s968_s11  ;;  %v149_v33 = vmul.f32 %v1014_v22, %v1000_v16  ;;  %s1040_s17 = sld [smem:[#allocation4 + $0x105]]  ;;  %v155_v38 = vmul.f32 %v1027_v28, %v1016_v23 }
  0x20   :  { %v146_v35 = vadd.f32 %v144_v21, %v140_v26  ;;  %v162_v36 = vmul.f32 %v1036_v32, %v1010_v20  ;;  %v145_v37 = vadd.f32 %v143_v24, %v139_v30  ;;  %s1048_s18 = sld [smem:[#allocation4 + $0x180]]  ;;  %v161_v40 = vmul.f32 %v1036_v32, %v1029_v29 }
  0x21   :  { %v1055_v41 = vstv %s980_s12  ;;  %v1058_v42 = vstv %s992_s13  ;;  %s747_s19 = sld [smem:[#allocation4 + $0x181]]  ;;  %v338_v43 = vadd.f32 %v336_v25, %v332_v19  ;;  %v348_v52 = vmul.f32 %v1050_v39, %v1014_v22 }
  0x22   :  { %v152_v44 = vadd.f32 %v150_v27, %v146_v35  ;;  %v151_v45 = vadd.f32 %v149_v33, %v145_v37  ;;  %v179_v46 = vmul.f32 %v1055_v41, %v960_v0  ;;  %v183_v47 = vmul.f32 %v1058_v42, %v966_v2  ;;  %s1064_s20 = sld [smem:[#allocation4 + $0x182]] }
  0x23   :  { %v1069_v49 = vstv %s1004_s14  ;;  %v1072_v50 = vstv %s1020_s15  ;;  %s749_s21 = sld [smem:[#allocation4 + $0x183]]  ;;  %v344_v51 = vadd.f32 %v342_v34, %v338_v43  ;;  %v354_v60 = vmul.f32 %v1066_v48, %v1027_v28 }
  0x24   :  { %v158_v53 = vadd.f32 %v156_v31, %v152_v44  ;;  %v157_v54 = vadd.f32 %v155_v38, %v151_v45  ;;  %v185_v55 = vadd.f32 %v183_v47, %v179_v46  ;;  %v189_v56 = vmul.f32 %v1069_v49, %v974_v5  ;;  %s750_s22 = sld [smem:[#allocation4 + $0x184]]  ;;  %v1118_v38 = vld [vmem:[#allocation7 + $0xb8] sm:$0xff] }
  0x25   :  { %v195_v57 = vmul.f32 %v1072_v50, %v984_v9  ;;  %v1081_v58 = vstv %s1031_s16  ;;  %v1084_v59 = vstv %s1040_s17  ;;  %s751_s23 = sld [smem:[#allocation4 + $0x185]]  ;;  %v350_v19 = vadd.f32 %v348_v52, %v344_v51 }
  0x26   :  { %v164_v61 = vadd.f32 %v162_v36, %v158_v53  ;;  %v163_v62 = vadd.f32 %v161_v40, %v157_v54  ;;  %v191_v63 = vadd.f32 %v189_v56, %v185_v55  ;;  %v201_v10 = vmul.f32 %v1081_v58, %v994_v13  ;;  %s1159_s26 = sld [smem:[#allocation4]] }
  0x27   :  { %v207_v12 = vmul.f32 %v1084_v59, %v1010_v20  ;;  %v1093_v14 = vstv %s1048_s18  ;;  %v1095_v17 = vstv %s747_s19  ;;  %v356_v45 = vadd.f32 %v354_v60, %v350_v19  ;;  %s1163_s27 = sld [smem:[#allocation4 + $0x1]] }
  0x28   :  { %169 = vrot.lane.b32.xlu0 %v164_v61, %s916_s24  ;;  %167 = vrot.lane.b32.xlu1 %v163_v62, %s916_s24  ;;  %v197_v21 = vadd.f32 %v195_v57, %v191_v63  ;;  %v224_v24 = vmul.f32 %v1093_v14, %v960_v0  ;;  %v228_v25 = vmul.f32 %v1095_v17, %v966_v2  ;;  %v1104_v26 = vstv %s1064_s20  ;;  %v1134_v57 = vld [vmem:[#allocation7 + $0x60] sm:$0xff]  ;;  %s1173_s28 = sld [smem:[#allocation4 + $0x2]] }
  0x29   :  { %v234_v27 = vmul.f32 %v1104_v26, %v974_v5  ;;  %v1108_v30 = vstv %s749_s21  ;;  %v223_v31 = vmul.f32 %v1093_v14, %v964_v1  ;;  %v227_v33 = vmul.f32 %v1095_v17, %v970_v3  ;;  %s1182_s29 = sld [smem:[#allocation4 + $0x3]] }
  0x2a   :  { %v203_v34 = vadd.f32 %v201_v10, %v197_v21  ;;  %v230_v35 = vadd.f32 %v228_v25, %v224_v24  ;;  %v240_v36 = vmul.f32 %v1108_v30, %v984_v9  ;;  %v1116_v37 = vstv %s750_s22  ;;  %v1142_v10 = vld [vmem:[#allocation7 + $0x70] sm:$0xff]  ;;  %s1188_s30 = sld [smem:[#allocation4 + $0x4]] }
  0x2b   :  { %v1120_v40 = vstv %s751_s23  ;;  %v229_v43 = vadd.f32 %v227_v33, %v223_v31  ;;  %v233_v44 = vmul.f32 %v1104_v26, %v978_v7  ;;  %v246_v51 = vmul.f32 %v1116_v37, %v994_v13  ;;  %v1151_v31 = vld [vmem:[#allocation7 + $0x90] sm:$0xff]  ;;  %s1200_s5 = sld [smem:[#allocation4 + $0x5]] }
  0x2c   :  { %v209_v46 = vadd.f32 %v207_v12, %v203_v34  ;;  %v236_v47 = vadd.f32 %v234_v27, %v230_v35  ;;  %v239_v52 = vmul.f32 %v1108_v30, %v1000_v16  ;;  %v252_v53 = vmul.f32 %v1120_v40, %v1010_v20  ;;  %v1144_v12 = vld [vmem:[#allocation7 + $0x80] sm:$0xff] }
  0x2d   :  { %v235_v54 = vadd.f32 %v233_v44, %v229_v43  ;;  %v245_v55 = vmul.f32 %v1116_v37, %v1016_v23  ;;  %v360_v56 = vmul.f32 %v1118_v38, %v1036_v32  ;;  %v377_v61 = vmul.f32 %v972_v4, %v1055_v41 }
  0x2e   :  { %v242_v60 = vadd.f32 %v240_v36, %v236_v47  ;;  %v381_v62 = vmul.f32 %v982_v8, %v1058_v42  ;;  %v387_v63 = vmul.f32 %v1006_v18, %v1069_v49  ;;  %v251_v21 = vmul.f32 %v1120_v40, %v1029_v29 }
  0x2f   :  { %v241_v19 = vadd.f32 %v239_v52, %v235_v54  ;;  %v393_v27 = vmul.f32 %v1050_v39, %v1072_v50  ;;  %v331_v33 = vmul.f32 %v1134_v57, %v976_v6  ;;  %v335_v35 = vmul.f32 %v1142_v10, %v988_v11 }
  0x30   :  { %214 = vrot.lane.b32.xlu0 %v209_v46, %s917_s25  ;;  %v248_v24 = vadd.f32 %v246_v51, %v242_v60  ;;  %v383_v25 = vadd.f32 %v381_v62, %v377_v61  ;;  %v341_v36 = vmul.f32 %v1144_v12, %v998_v15  ;;  %v362_v44 = vadd.f32 %v360_v56, %v356_v45  ;;  %v1165_v51 = vld [vmem:[#allocation7 + $0xa0] sm:$0xff] }
  0x31   :  { %v247_v34 = vadd.f32 %v245_v55, %v241_v19  ;;  %v399_v47 = vmul.f32 %v1066_v48, %v1081_v58  ;;  %v337_v6 = vadd.f32 %v335_v35, %v331_v33  ;;  %v347_v52 = vmul.f32 %v1151_v31, %v1014_v22  ;;  %v1178_v55 = vld [vmem:[#allocation7 + $0xb0] sm:$0xff] }
  0x32   :  { %v254_v43 = vadd.f32 %v252_v53, %v248_v24  ;;  %v389_v46 = vadd.f32 %v387_v63, %v383_v25  ;;  %v178_v11 = vmul.f32 %v1055_v41, %v964_v1  ;;  %v182_v15 = vmul.f32 %v1058_v42, %v970_v3 }
  0x33   :  { %v253_v45 = vadd.f32 %v251_v21, %v247_v34  ;;  %v405_v54 = vmul.f32 %v1118_v38, %v1084_v59  ;;  %v188_v22 = vmul.f32 %v1069_v49, %v978_v7  ;;  %v343_v56 = vadd.f32 %v341_v36, %v337_v6 }
  0x34   :  { %259 = vrot.lane.b32.xlu1 %v254_v43, %s918_s2  ;;  %v395_v53 = vadd.f32 %v393_v27, %v389_v46  ;;  %v184_v60 = vadd.f32 %v182_v15, %v178_v11  ;;  %v194_v61 = vmul.f32 %v1072_v50, %v1000_v16  ;;  %v376_v62 = vmul.f32 %v1134_v57, %v1055_v41 }
  0x35   :  { %v353_v19 = vmul.f32 %v1165_v51, %v1027_v28  ;;  %v380_v21 = vmul.f32 %v1142_v10, %v1058_v42  ;;  %v386_v24 = vmul.f32 %v1144_v12, %v1069_v49  ;;  %v349_v25 = vadd.f32 %v347_v52, %v343_v56 }
  0x36   :  { %v401_v63 = vadd.f32 %v399_v47, %v395_v53  ;;  %v359_v27 = vmul.f32 %v1178_v55, %v1036_v32  ;;  %v190_v33 = vadd.f32 %v188_v22, %v184_v60  ;;  %v200_v41 = vmul.f32 %v1081_v58, %v1016_v23 }
  0x37   :  { %v382_v28 = vadd.f32 %v380_v21, %v376_v62  ;;  %v392_v42 = vmul.f32 %v1151_v31, %v1072_v50  ;;  %v421_v49 = vmul.f32 %v1134_v57, %v1093_v14  ;;  %v425_v32 = vmul.f32 %v1142_v10, %v1095_v17 }
  0x38   :  { %257 = vrot.lane.b32.xlu0 %v253_v45, %s918_s2  ;;  %v196_v34 = vadd.f32 %v194_v61, %v190_v33  ;;  %v206_v35 = vmul.f32 %v1084_v59, %v1029_v29  ;;  %v398_v36 = vmul.f32 %v1165_v51, %v1081_v58  ;;  %v431_v43 = vmul.f32 %v1144_v12, %v1104_v26 }
  0x39   :  { %v407_v46 = vadd.f32 %v405_v54, %v401_v63  ;;  %v355_v50 = vadd.f32 %v353_v19, %v349_v25  ;;  %v388_v47 = vadd.f32 %v386_v24, %v382_v28  ;;  %v427_v6 = vadd.f32 %v425_v32, %v421_v49 }
  0x3a   :  { %v202_v52 = vadd.f32 %v200_v41, %v196_v34  ;;  %v437_v11 = vmul.f32 %v1151_v31, %v1108_v30  ;;  %v1218_v15 = vstv %s1159_s26  ;;  %v1221_v45 = vstv %s1163_s27 }
  0x3b   :  { %v394_v58 = vadd.f32 %v392_v42, %v388_v47  ;;  %v433_v53 = vadd.f32 %v431_v43, %v427_v6  ;;  %v287_v54 = vmul.f32 %v1218_v15, %v972_v4  ;;  %v291_v22 = vmul.f32 %v1221_v45, %v982_v8 }
  0x3c   :  { %367 = vrot.lane.b32.xlu1 %v362_v44, %s919_s6  ;;  %v208_v56 = vadd.f32 %v206_v35, %v202_v52  ;;  %v295_v60 = vstv %s1173_s28  ;;  %v1230_v61 = vstv %s1182_s29  ;;  %v1233_v62 = vstv %s1188_s30 }
  0x3d   :  { %v404_v63 = vmul.f32 %v1178_v55, %v1084_v59  ;;  %v443_v44 = vmul.f32 %v1165_v51, %v1116_v37  ;;  %v293_v19 = vadd.f32 %v291_v22, %v287_v54  ;;  %v297_v21 = vmul.f32 %v295_v60, %v1006_v18 }
  0x3e   :  { %212 = vrot.lane.b32.xlu2 %v208_v56, %s917_s25  ;;  %v439_v24 = vadd.f32 %v437_v11, %v433_v53  ;;  %v303_v25 = vmul.f32 %v1230_v61, %v1050_v39  ;;  %v1244_v33 = vstv %s1200_s5  ;;  %v286_v41 = vmul.f32 %v1218_v15, %v1134_v57 }
  0x3f   :  { %v361_v59 = vadd.f32 %v359_v27, %v355_v50  ;;  %v400_v28 = vadd.f32 %v398_v36, %v394_v58  ;;  %v299_v42 = vadd.f32 %v297_v21, %v293_v19  ;;  %v309_v49 = vmul.f32 %v1233_v62, %v1066_v48 }
  0x40   :  { %412 = vrot.lane.b32.xlu0 %v407_v46, %s920_s0  ;;  %v290_v32 = vmul.f32 %v1221_v45, %v1142_v10  ;;  %v296_v34 = vmul.f32 %v295_v60, %v1144_v12  ;;  %v449_v35 = vmul.f32 %v1178_v55, %v1120_v40  ;;  %v315_v57 = vmul.f32 %v1244_v33, %v1118_v38 }
  0x41   :  { %v305_v43 = vadd.f32 %v303_v25, %v299_v42  ;;  %v422_v27 = vmul.f32 %v972_v4, %v1093_v14  ;;  %v445_v36 = vadd.f32 %v443_v44, %v439_v24  ;;  %v302_v50 = vmul.f32 %v1230_v61, %v1151_v31 }
  0x42   :  { %v292_v46 = vadd.f32 %v290_v32, %v286_v41  ;;  %v426_v10 = vmul.f32 %v982_v8, %v1095_v17  ;;  %v406_v12 = vadd.f32 %v404_v63, %v400_v28  ;;  %v432_v6 = vmul.f32 %v1006_v18, %v1104_v26 }
  0x43   :  { %v311_v47 = vadd.f32 %v309_v49, %v305_v43  ;;  %v308_v11 = vmul.f32 %v1233_v62, %v1165_v51  ;;  %v451_v58 = vadd.f32 %v449_v35, %v445_v36  ;;  %v314_v8 = vmul.f32 %v1244_v33, %v1178_v55  ;;  %v464_v35 = vld [vmem:[#allocation8] sm:$0xff]  ;;  %v467_v36 = vld [vmem:[#allocation8 + $0x18] sm:$0xff] }
  0x44   :  { %365 = vrot.lane.b32.xlu1 %v361_v59, %s919_s6  ;;  %v298_v52 = vadd.f32 %v296_v34, %v292_v46  ;;  %v428_v4 = vadd.f32 %v426_v10, %v422_v27  ;;  %v438_v18 = vmul.f32 %v1050_v39, %v1108_v30  ;;  %v444_v54 = vmul.f32 %v1066_v48, %v1116_v37  ;;  %v466_v27 = vld [vmem:[#allocation8 + $0x10] sm:$0xff] }
  0x45   :  { %v317_v14 = vadd.f32 %v315_v57, %v311_v47  ;;  %v450_v56 = vmul.f32 %v1118_v38, %v1120_v40  ;;  %v101_v39 = vmul.f32 %v1221_v45, %v966_v2  ;;  %v107_v30 = vmul.f32 %v295_v60, %v974_v5  ;;  %v465_v57 = vld [vmem:[#allocation8 + $0x8] sm:$0xff] }
  0x46   :  { %v304_v53 = vadd.f32 %v302_v50, %v298_v52  ;;  %v434_v17 = vadd.f32 %v432_v6, %v428_v4  ;;  %v97_v63 = vmul.f32 %v1218_v15, %v960_v0  ;;  %v100_v48 = vmul.f32 %v1221_v45, %v970_v3 }
  0x47   :  { %322 = vrot.lane.b32.xlu2 %v317_v14, %s921_s7  ;;  %v96_v37 = vmul.f32 %v1218_v15, %v964_v1  ;;  %v113_v38 = vmul.f32 %v1230_v61, %v984_v9  ;;  %v106_v44 = vmul.f32 %v295_v60, %v978_v7  ;;  %v119_v2 = vmul.f32 %v1233_v62, %v994_v13 }
  0x48   :  { %410 = vrot.lane.b32.xlu0 %v406_v12, %s920_s0  ;;  %v310_v26 = vadd.f32 %v308_v11, %v304_v53  ;;  %v440_v51 = vadd.f32 %v438_v18, %v434_v17  ;;  %v103_v40 = vadd.f32 %v101_v39, %v97_v63  ;;  %v112_v0 = vmul.f32 %v1230_v61, %v1000_v16  ;;  %v645_v53 = vld [vmem:[#allocation10 + $0x30] sm:$0xff]  ;;  %v639_v39 = vld [vmem:[#allocation10] sm:$0xff] }
  0x49   :  { %v102_v19 = vadd.f32 %v100_v48, %v96_v37  ;;  %v125_v3 = vmul.f32 %v1244_v33, %v1010_v20  ;;  %v118_v1 = vmul.f32 %v1233_v62, %v1016_v23  ;;  %v124_v7 = vmul.f32 %v1244_v33, %v1029_v29 }
  0x4a   :  { %v316_v31 = vadd.f32 %v314_v8, %v310_v26  ;;  %v446_v22 = vadd.f32 %v444_v54, %v440_v51  ;;  %v109_v5 = vadd.f32 %v107_v30, %v103_v40  ;;  %v644_v8 = vld [vmem:[#allocation10 + $0x28] sm:$0xff]  ;;  %v643_v26 = vld [vmem:[#allocation10 + $0x20] sm:$0xff]  ;;  %v642_v51 = vld [vmem:[#allocation10 + $0x18] sm:$0xff] }
  0x4b   :  { %v108_v21 = vadd.f32 %v106_v44, %v102_v19  ;;  %v641_v54 = vld [vmem:[#allocation10 + $0x10] sm:$0xff] }
  0x4c   :  { %455 = vrot.lane.b32.xlu1 %v451_v58, %s922_s1  ;;  %v452_v55 = vadd.f32 %v450_v56, %v446_v22  ;;  %v115_v45 = vadd.f32 %v113_v38, %v109_v5  ;;  %v646_v58 = vld [vmem:[#allocation10 + $0x38] sm:$0xff]  ;;  %v640_v22 = vld [vmem:[#allocation10 + $0x8] sm:$0xff] }
  0x4d   :  { %v114_v9 = vadd.f32 %v112_v0, %v108_v21  ;;  %680 = vmatpush.msra.mxu1 %v646_v58  ;;  %791 = vmatpush.msra.mxu2 %v646_v58 }
  0x4e   :  { %v121_v15 = vadd.f32 %v119_v2, %v115_v45  ;;  %792 = vmatpush.msra.mxu3 %v646_v58 }
  0x4f   :  { %320 = vrot.lane.b32.xlu2 %v316_v31, %s921_s7  ;;  %v120_v60 = vadd.f32 %v118_v1, %v114_v9  ;;  %681 = vmatpush.msra.mxu1 %v645_v53 }
  0x50   :  { %v127_v13 = vadd.f32 %v125_v3, %v121_v15  ;;  %793 = vmatpush.msra.mxu2 %v645_v53  ;;  %794 = vmatpush.msra.mxu3 %v645_v53 }
  0x51   :  { %v126_v24 = vadd.f32 %v124_v7, %v120_v60  ;;  %682 = vmatpush.msra.mxu1 %v644_v8 }
  0x52   :  { %130 = vst.msk [vmem:[#allocation2 + $0x8] sm:$0xff] %vm128_vm0, %v127_v13  ;;  %795 = vmatpush.msra.mxu2 %v644_v8  ;;  %796 = vmatpush.msra.mxu3 %v644_v8 }
  0x53   :  { %129 = vst.msk [vmem:[#allocation2] sm:$0xff] %vm128_vm0, %v126_v24  ;;  %683 = vmatpush.msra.mxu1 %v643_v26 }
  0x54   :  { %797 = vmatpush.msra.mxu2 %v643_v26  ;;  %798 = vmatpush.msra.mxu3 %v643_v26 }
  0x55   :  { %684 = vmatpush.msra.mxu1 %v642_v51 }
  0x56   :  { %799 = vmatpush.msra.mxu2 %v642_v51  ;;  %800 = vmatpush.msra.mxu3 %v642_v51 }
  0x57   :  { %457 = vrot.lane.b32.xlu2 %v452_v55, %s922_s1  ;;  %685 = vmatpush.msra.mxu1 %v641_v54 }
  0x58   :  { %801 = vmatpush.msra.mxu2 %v641_v54  ;;  %802 = vmatpush.msra.mxu3 %v641_v54 }
  0x59   :  { %686 = vmatpush.msra.mxu1 %v640_v22 }
  0x5a   :  { %803 = vmatpush.msra.mxu2 %v640_v22  ;;  %804 = vmatpush.msra.mxu3 %v640_v22 }
  0x5b   :  { %687 = vmatpush.msra.mxu1 %v639_v39 }
  0x5c   :  { %805 = vmatpush.msra.mxu2 %v639_v39  ;;  %806 = vmatpush.msra.mxu3 %v639_v39 }
  0x98   :  { %v213_v16 = vpop.permute.xlu2 %212 }
  0x9a   :  { %v170_v20 = vpop.permute.xlu0 %169  ;;  %v168_v61 = vpop.permute.xlu1 %167 }
  0x9b   :  { %175 = vst.msk [vmem:[#allocation2 + $0x8] sm:$0xff] %vm173_vm1, %v170_v20 }
  0x9c   :  { %174 = vst.msk [vmem:[#allocation2] sm:$0xff] %vm173_vm1, %v168_v61 }
  0x9d   :  { %219 = vst.msk [vmem:[#allocation2] sm:$0xff] %vm218_vm2, %v213_v16 }
  0xa1   :  { %v323_v29 = vpop.permute.xlu2 %322 }
  0xa2   :  { %v215_v23 = vpop.permute.xlu0 %214 }
  0xa3   :  { %220 = vst.msk [vmem:[#allocation2 + $0x8] sm:$0xff] %vm218_vm2, %v215_v23 }
  0xa6   :  { %v260_v62 = vpop.permute.xlu1 %259 }
  0xa7   :  { %265 = vst.msk [vmem:[#allocation2 + $0x8] sm:$0xff] %vm263_vm3, %v260_v62 }
  0xa8   :  { %328 = vst.msk [vmem:[#allocation2 + $0x8] sm:$0xff] %vm326_vm4, %v323_v29 }
  0xa9   :  { %v321_v33 = vpop.permute.xlu2 %320 }
  0xaa   :  { %v258_v25 = vpop.permute.xlu0 %257 }
  0xab   :  { %264 = vst.msk [vmem:[#allocation2] sm:$0xff] %vm263_vm3, %v258_v25 }
  0xac   :  { %327 = vst.msk [vmem:[#allocation2] sm:$0xff] %vm326_vm4, %v321_v33 }
  0xae   :  { %v368_v41 = vpop.permute.xlu1 %367 }
  0xaf   :  { %373 = vst.msk [vmem:[#allocation2 + $0x8] sm:$0xff] %vm371_vm5, %v368_v41 }
  0xb1   :  { %v458_v28 = vpop.permute.xlu2 %457 }
  0xb2   :  { %v413_v59 = vpop.permute.xlu0 %412 }
  0xb3   :  { %418 = vst.msk [vmem:[#allocation2 + $0x8] sm:$0xff] %vm416_vm6, %v413_v59 }
  0xb4   :  { %463 = vst.msk [vmem:[#allocation2 + $0x8] sm:$0xff] %vm461_vm7, %v458_v28 }
  0xb6   :  { %v366_v42 = vpop.permute.xlu1 %365 }
  0xb7   :  { %372 = vst.msk [vmem:[#allocation2] sm:$0xff] %vm371_vm5, %v366_v42 }
  0xba   :  { %v411_v49 = vpop.permute.xlu0 %410 }
  0xbb   :  { %417 = vst.msk [vmem:[#allocation2] sm:$0xff] %vm416_vm6, %v411_v49  ;;  %v469_v32 = vld [vmem:[#allocation2 + $0x8] sm:$0xff] }
  0xbc   :  { %496 = vmatpush.msra.mxu0 %v469_v32 }
  0xbe   :  { %v456_v34 = vpop.permute.xlu1 %455 }
  0xbf   :  { %462 = vst.msk [vmem:[#allocation2] sm:$0xff] %vm461_vm7, %v456_v34 }
  0xc6   :  { %v468_v43 = vld [vmem:[#allocation2] sm:$0xff] }
  0xc7   :  { %497 = vmatpush.msra.mxu0 %v468_v43 }
  0xc8   :  { %775 = vmatmul.msk.f32.vlgmr.msra.gmra.mxu0 %vm128_vm0, %v464_v35 }
  0xd0   :  { %776 = vmatmul.msk.f32.gmra.mxu0 %vm128_vm0, %v465_v57 }
  0xd8   :  { %777 = vmatmul.msk.f32.gmra.mxu0 %vm128_vm0, %v466_v27 }
  0xe0   :  { %778 = vmatmul.msk.f32.gmra.mxu0 %vm128_vm0, %v467_v36 }
 0x145   :  { %v499_v46 = vpop.f32.mrf.mxu0 }
 0x146   :  { %511 = vst.msk [vmem:[#allocation3] sm:$0xff] %vm128_vm0, %v499_v46  ;;  %583 = vrot.lane.b32.xlu0 %v499_v46, %s918_s2  ;;  %567 = vrot.lane.b32.xlu1 %v499_v46, %s921_s7 }
 0x147   :  { %554 = vrot.lane.b32.xlu2 %v499_v46, %s919_s6 }
 0x14d   :  { %v502_v50 = vpop.f32.mrf.mxu0 }
 0x14e   :  { %528 = vrot.lane.b32.xlu1 %v499_v46, %s922_s1  ;;  %558 = vrot.lane.b32.xlu0 %v502_v50, %s920_s0 }
 0x14f   :  { %599 = vrot.lane.b32.xlu2 %v499_v46, %s917_s25 }
 0x155   :  { %v1326_v10 = vpop.f32.mrf.mxu0 }
 0x156   :  { %615 = vrot.lane.b32.xlu1 %v499_v46, %s916_s24  ;;  %587 = vrot.lane.b32.xlu0 %v502_v50, %s921_s7 }
 0x157   :  { %513 = vrot.lane.b32.xlu2 %v502_v50, %s916_s24 }
 0x15d   :  { %v1337_v12 = vpop.f32.mrf.mxu0 }
 0x15e   :  { %571 = vrot.lane.b32.xlu1 %v502_v50, %s919_s6  ;;  %518 = vrot.lane.b32.xlu0 %v1326_v10, %s917_s25 }
 0x15f   :  { %603 = vrot.lane.b32.xlu2 %v502_v50, %s918_s2 }
 0x166   :  { %619 = vrot.lane.b32.xlu1 %v502_v50, %s917_s25  ;;  %575 = vrot.lane.b32.xlu0 %v1326_v10, %s920_s0 }
 0x167   :  { %533 = vrot.lane.b32.xlu2 %v1326_v10, %s916_s24 }
 0x16e   :  { %562 = vrot.lane.b32.xlu1 %v1326_v10, %s922_s1  ;;  %523 = vrot.lane.b32.xlu0 %v1337_v12, %s918_s2 }
 0x16f   :  { %591 = vrot.lane.b32.xlu2 %v1326_v10, %s919_s6 }
 0x176   :  { %607 = vrot.lane.b32.xlu1 %v1326_v10, %s921_s7  ;;  %611 = vrot.lane.b32.xlu0 %v1337_v12, %s919_s6 }
 0x177   :  { %579 = vrot.lane.b32.xlu2 %v1337_v12, %s922_s1 }
 0x17e   :  { %595 = vrot.lane.b32.xlu1 %v1337_v12, %s920_s0  ;;  %623 = vrot.lane.b32.xlu0 %v1326_v10, %s918_s2 }
 0x17f   :  { %537 = vrot.lane.b32.xlu2 %v1337_v12, %s917_s25 }
 0x186   :  { %545 = vrot.lane.b32.xlu1 %v502_v50, %s922_s1  ;;  %541 = vrot.lane.b32.xlu0 %v499_v46, %s920_s0 }
 0x187   :  { %627 = vrot.lane.b32.xlu2 %v1337_v12, %s921_s7 }
 0x18f   :  { %550 = vrot.lane.b32.xlu2 %v1337_v12, %s916_s24 }
 0x1a1   :  { %v555_v47 = vpop.permute.xlu2 %554 }
 0x1a2   :  { %557 = vst.msk [vmem:[#allocation3 + $0x18] sm:$0xff] %vm128_vm0, %v555_v47 }
 0x1a9   :  { %v600_v6 = vpop.permute.xlu2 %599 }
 0x1aa   :  { %602 = vst.msk [vmem:[#allocation3 + $0x30] sm:$0xff] %vm128_vm0, %v600_v6 }
 0x1b1   :  { %v514_v52 = vpop.permute.xlu2 %513 }
 0x1b2   :  { %516 = vst.msk [vmem:[#allocation3] sm:$0xff] %vm173_vm1, %v514_v52 }
 0x1b8   :  { %v584_v11 = vpop.permute.xlu0 %583  ;;  %v568_v4 = vpop.permute.xlu1 %567 }
 0x1b9   :  { %586 = vst.msk [vmem:[#allocation3 + $0x28] sm:$0xff] %vm128_vm0, %v584_v11  ;;  %v604_v14 = vpop.permute.xlu2 %603 }
 0x1ba   :  { %570 = vst.msk [vmem:[#allocation3 + $0x20] sm:$0xff] %vm128_vm0, %v568_v4 }
 0x1bb   :  { %606 = vst.msk [vmem:[#allocation3 + $0x30] sm:$0xff] %vm173_vm1, %v604_v14 }
 0x1c0   :  { %v529_v17 = vpop.permute.xlu1 %528  ;;  %v559_v18 = vpop.permute.xlu0 %558 }
 0x1c1   :  { %531 = vst.msk [vmem:[#allocation3 + $0x8] sm:$0xff] %vm128_vm0, %v529_v17  ;;  %v534_v31 = vpop.permute.xlu2 %533 }
 0x1c2   :  { %532 = vst.msk [vmem:[#allocation3 + $0x8] sm:$0xff] %vm173_vm1, %v502_v50 }
 0x1c3   :  { %561 = vst.msk [vmem:[#allocation3 + $0x18] sm:$0xff] %vm173_vm1, %v559_v18 }
 0x1c4   :  { %536 = vst.msk [vmem:[#allocation3 + $0x8] sm:$0xff] %vm218_vm2, %v534_v31 }
 0x1c8   :  { %v616_v56 = vpop.permute.xlu1 %615  ;;  %v588_v55 = vpop.permute.xlu0 %587 }
 0x1c9   :  { %618 = vst.msk [vmem:[#allocation3 + $0x38] sm:$0xff] %vm128_vm0, %v616_v56  ;;  %v592_v30 = vpop.permute.xlu2 %591 }
 0x1ca   :  { %590 = vst.msk [vmem:[#allocation3 + $0x28] sm:$0xff] %vm173_vm1, %v588_v55 }
 0x1cb   :  { %594 = vst.msk [vmem:[#allocation3 + $0x28] sm:$0xff] %vm218_vm2, %v592_v30 }
 0x1d0   :  { %v572_v63 = vpop.permute.xlu1 %571  ;;  %v519_v48 = vpop.permute.xlu0 %518 }
 0x1d1   :  { %574 = vst.msk [vmem:[#allocation3 + $0x20] sm:$0xff] %vm173_vm1, %v572_v63  ;;  %v580_v37 = vpop.permute.xlu2 %579 }
 0x1d2   :  { %521 = vst.msk [vmem:[#allocation3] sm:$0xff] %vm218_vm2, %v519_v48 }
 0x1d8   :  { %v620_v38 = vpop.permute.xlu1 %619  ;;  %v576_v40 = vpop.permute.xlu0 %575 }
 0x1d9   :  { %622 = vst.msk [vmem:[#allocation3 + $0x38] sm:$0xff] %vm173_vm1, %v620_v38  ;;  %v538_v44 = vpop.permute.xlu2 %537 }
 0x1da   :  { %578 = vst.msk [vmem:[#allocation3 + $0x20] sm:$0xff] %vm218_vm2, %v576_v40 }
 0x1db   :  { %582 = vst.msk [vmem:[#allocation3 + $0x20] sm:$0xff] %vm263_vm3, %v580_v37 }
 0x1dc   :  { %540 = vst.msk [vmem:[#allocation3 + $0x8] sm:$0xff] %vm263_vm3, %v538_v44 }
 0x1e0   :  { %v563_v19 = vpop.permute.xlu1 %562  ;;  %v524_v2 = vpop.permute.xlu0 %523 }
 0x1e1   :  { %565 = vst.msk [vmem:[#allocation3 + $0x18] sm:$0xff] %vm218_vm2, %v563_v19  ;;  %v628_v9 = vpop.permute.xlu2 %627 }
 0x1e2   :  { %566 = vst.msk [vmem:[#allocation3 + $0x18] sm:$0xff] %vm263_vm3, %v1337_v12  ;;  %v635_v15 = vld [vmem:[#allocation3 + $0x20] sm:$0xff] }
 0x1e3   :  { %526 = vst.msk [vmem:[#allocation3] sm:$0xff] %vm263_vm3, %v524_v2  ;;  %v632_v60 = vld [vmem:[#allocation3 + $0x8] sm:$0xff] }
 0x1e8   :  { %v608_v5 = vpop.permute.xlu1 %607  ;;  %v612_v0 = vpop.permute.xlu0 %611 }
 0x1e9   :  { %610 = vst.msk [vmem:[#allocation3 + $0x30] sm:$0xff] %vm218_vm2, %v608_v5  ;;  %v634_v21 = vld [vmem:[#allocation3 + $0x18] sm:$0xff]  ;;  %v551_v61 = vpop.permute.xlu2 %550 }
 0x1ea   :  { %614 = vst.msk [vmem:[#allocation3 + $0x30] sm:$0xff] %vm263_vm3, %v612_v0  ;;  %v631_v3 = vld [vmem:[#allocation3] sm:$0xff]  ;;  %782 = vmatmul.msk.f32.vlgmr.msra.gmra.mxu2 %vm647_vm8, %v634_v21 }
 0x1eb   :  { %779 = vmatmul.msk.f32.vlgmr.msra.gmra.mxu1 %vm647_vm8, %v631_v3 }
 0x1f0   :  { %v596_v45 = vpop.permute.xlu1 %595  ;;  %v624_v1 = vpop.permute.xlu0 %623 }
 0x1f1   :  { %598 = vst.msk [vmem:[#allocation3 + $0x28] sm:$0xff] %vm263_vm3, %v596_v45  ;;  %v637_v7 = vld [vmem:[#allocation3 + $0x30] sm:$0xff] }
 0x1f2   :  { %626 = vst.msk [vmem:[#allocation3 + $0x38] sm:$0xff] %vm218_vm2, %v624_v1  ;;  %783 = vmatmul.msk.f32.gmra.mxu2 %vm647_vm8, %v635_v15  ;;  %785 = vmatmul.msk.f32.vlgmr.msra.gmra.mxu3 %vm647_vm8, %v637_v7 }
 0x1f3   :  { %630 = vst.msk [vmem:[#allocation3 + $0x38] sm:$0xff] %vm263_vm3, %v628_v9  ;;  %780 = vmatmul.msk.f32.gmra.mxu1 %vm647_vm8, %v632_v60 }
 0x1f8   :  { %v546_v13 = vpop.permute.xlu1 %545  ;;  %v542_v24 = vpop.permute.xlu0 %541  ;;  %v636_v16 = vld [vmem:[#allocation3 + $0x28] sm:$0xff] }
 0x1f9   :  { %544 = vst.msk [vmem:[#allocation3 + $0x10] sm:$0xff] %vm128_vm0, %v542_v24 }
 0x1fa   :  { %548 = vst.msk [vmem:[#allocation3 + $0x10] sm:$0xff] %vm173_vm1, %v546_v13  ;;  %784 = vmatmul.msk.f32.gmra.mxu2 %vm647_vm8, %v636_v16  ;;  %v638_v20 = vld [vmem:[#allocation3 + $0x38] sm:$0xff] }
 0x1fb   :  { %549 = vst.msk [vmem:[#allocation3 + $0x10] sm:$0xff] %vm218_vm2, %v1326_v10  ;;  %786 = vmatmul.msk.f32.gmra.mxu3 %vm647_vm8, %v638_v20 }
 0x1fc   :  { %553 = vst.msk [vmem:[#allocation3 + $0x10] sm:$0xff] %vm263_vm3, %v551_v61 }
 0x203   :  { %v633_v23 = vld [vmem:[#allocation3 + $0x10] sm:$0xff] }
 0x204   :  { %781 = vmatmul.msk.f32.gmra.mxu1 %vm647_vm8, %v633_v23 }
 0x268   :  { %v689_v29 = vpop.f32.mrf.mxu1 }
 0x269   :  { %713 = vst [vmem:[%s1432_s4] sm:$0xff] %v689_v29 }
 0x26d   :  { %v698_v62 = vpop.f32.mrf.mxu2 }
 0x26e   :  { %716 = vst [vmem:[%s1432_s4 + $0x18] sm:$0xff] %v698_v62 }
 0x270   :  { %v692_v25 = vpop.f32.mrf.mxu1 }
 0x271   :  { %714 = vst [vmem:[%s1432_s4 + $0x8] sm:$0xff] %v692_v25 }
 0x275   :  { %v701_v33 = vpop.f32.mrf.mxu2  ;;  %v707_v41 = vpop.f32.mrf.mxu3 }
 0x276   :  { %787 = vst [vmem:[%s1432_s4 + $0x20] sm:$0xff] %v701_v33 }
 0x277   :  { %789 = vst [vmem:[%s1432_s4 + $0x30] sm:$0xff] %v707_v41 }
 0x27d   :  { %v704_v59 = vpop.f32.mrf.mxu2 }
 0x27e   :  { %788 = vst [vmem:[%s1432_s4 + $0x28] sm:$0xff] %v704_v59  ;;  %v710_v28 = vpop.f32.mrf.mxu3 }
 0x27f   :  { %790 = vst [vmem:[%s1432_s4 + $0x38] sm:$0xff] %v710_v28 }
 0x281   :  { %v695_v42 = vpop.f32.mrf.mxu1 }
 0x282   :  { %715 = vst [vmem:[%s1432_s4 + $0x10] sm:$0xff] %v695_v42 }
 0x283   :  { %726 = vsyncpa [#allocation5], 1 }
 0x284   :  { %727 = vsyncpa [#allocation9], 1 }
 0x285   :  { %728 = vsyncpa [#allocation6], 1 }

</bundles_post_ra>
